<compile_context>
chip_gen: v6e
topology: v6e:2x2x1
jax: 0.10.0
libtpu: 0.0.40
codegen_flags: <defaults>
</compile_context>

<pallas_src>
import functools

import jax
import jax.numpy as jnp
from jax.experimental import pallas as pl
from jax.experimental.pallas import tpu as pltpu


CFG = dict(
    vocab_size=50,
    max_position=32,
    type_vocab=2,
    hidden=32,          # num_inputs (BERT hidden size)
    heads=2,
    intermediate=64,
    layers=2,
    num_hiddens=16,     # classifier hidden width
)


# --------------------------- in-kernel helpers -------------------------------

def _layer_norm(x, g, b):
    mean = jnp.mean(x, axis=-1, keepdims=True)
    c = x - mean
    var = jnp.mean(c * c, axis=-1, keepdims=True)
    return c * jax.lax.rsqrt(var + 1e-12) * g + b


def _dot(a_f32, w_bf16):
    # bf16 operands, f32 accumulation on the MXU; weights are already bf16.
    return jnp.dot(a_f32.astype(jnp.bfloat16), w_bf16,
                   preferred_element_type=jnp.float32)


# --------------------------- fused encoder kernel ----------------------------

def _encoder_kernel(b, s, h, heads, hd, inter, nh, L,
                    emb_ref, mask_ref, gvec_ref,
                    wqkv_ref, wo_ref, wi_ref, wf_ref, lvec_ref,
                    pool_w_ref, w1_ref, w2p_ref,
                    out_ref):
    rows = b * s
    scale = 1.0 / float(hd) ** 0.5

    # ---- global packed vectors (one (8,128) tile) ----
    gvec = gvec_ref[...]
    emb_g = gvec[0:1, 0:h]
    emb_b = gvec[1:2, 0:h]
    pool_b = gvec[2:3, 0:h]
    b1 = gvec[3:4, 0:2 * nh]
    b2 = gvec[4:5, :]                                   # (1, 128), padded

    # Pre-broadcast additive mask, loaded once for all heads / layers.
    mask_b = mask_ref[...]                              # (B, S, S) f32

    # ---- embedding LayerNorm ----
    x = _layer_norm(emb_ref[...], emb_g, emb_b)         # (B*S, H) f32

    # ---- L transformer layers, fully unrolled (all weights VMEM-resident) ----
    for l in range(L):
        lvec = lvec_ref[l]                              # (8, 128) f32
        bqkv = lvec[0:1, 0:3 * h]
        bo = lvec[1:2, 0:h]
        g1 = lvec[2:3, 0:h]
        be1 = lvec[3:4, 0:h]
        bi = lvec[4:5, 0:inter]
        bf = lvec[5:6, 0:h]
        g2 = lvec[6:7, 0:h]
        be2 = lvec[7:8, 0:h]

        # fused QKV projection: one (B*S,H)x(H,3H) MXU pass, bf16 weights.
        qkv = _dot(x, wqkv_ref[l]) + bqkv               # (B*S, 3H) f32

        # TODO(synk): heads=2 per-head loop kept (safe Mosaic lowering); a
        # single 'bqhd,bkhd->bhqk' batched einsum would fuse it further.
        ctx_heads = []
        for hh in range(heads):
            q = qkv[:, 0 * h + hh * hd: 0 * h + (hh + 1) * hd].reshape(b, s, hd)
            k = qkv[:, 1 * h + hh * hd: 1 * h + (hh + 1) * hd].reshape(b, s, hd)
            v = qkv[:, 2 * h + hh * hd: 2 * h + (hh + 1) * hd].reshape(b, s, hd)
            sc = jnp.einsum("bqd,bkd->bqk",
                            q.astype(jnp.bfloat16), k.astype(jnp.bfloat16),
                            preferred_element_type=jnp.float32) * scale
            sc = sc + mask_b
            sc = sc - jnp.max(sc, axis=-1, keepdims=True)
            p = jnp.exp(sc)
            p = p * pl.reciprocal(jnp.sum(p, axis=-1, keepdims=True), approx=True)
            ctx = jnp.einsum("bqk,bkd->bqd",
                             p.astype(jnp.bfloat16), v.astype(jnp.bfloat16),
                             preferred_element_type=jnp.float32)
            ctx_heads.append(ctx.reshape(rows, hd))
        ctx = jnp.concatenate(ctx_heads, axis=-1)       # (B*S, H)

        # attention output projection + residual LayerNorm
        attn_out = _dot(ctx, wo_ref[l]) + bo
        x = _layer_norm(attn_out + x, g1, be1)

        # feed-forward + residual LayerNorm
        # TODO(synk): HF BERT uses erf-GELU; tanh approximation keeps lowering simple.
        inter_a = jax.nn.gelu(_dot(x, wi_ref[l]) + bi, approximate=True)
        ffn = _dot(inter_a, wf_ref[l]) + bf
        x = _layer_norm(ffn + x, g2, be2)

    # ---- pooler + fused class/domain heads ----
    # [CLS] tokens: one reshape + static slice instead of B slice-copies.
    cls_tok = x.reshape(b, s, h)[:, 0:1, :].reshape(b, h)          # (B, H)
    pooled = jnp.tanh(_dot(cls_tok, pool_w_ref[...]) + pool_b)     # (B, H)
    # ReverseLayerF.apply(pooled, alpha) is identity in the forward pass.
    h1 = jnp.tanh(_dot(pooled, w1_ref[...]) + b1)                  # (B, 2*nh)
    # block-diagonal second layer, padded to 128 lanes -> single unmasked store.
    out_ref[...] = _dot(h1, w2p_ref[...]) + b2                     # (B, 128)


def make_encoder_call(cfg, b, s):
    h = cfg["hidden"]
    heads = cfg["heads"]
    hd = h // heads
    inter = cfg["intermediate"]
    nh = cfg["num_hiddens"]
    L = cfg["layers"]
    rows = b * s

    def full(shape):
        # Whole-array block, VMEM resident (single grid step).
        return pl.BlockSpec(shape, lambda i, _n=len(shape): (0,) * _n)

    in_specs = [
        full((rows, h)),          # emb                 f32
        full((b, s, s)),          # additive mask       f32
        full((8, 128)),           # gvec (packed)       f32
        full((L, h, 3 * h)),      # wqkv                bf16
        full((L, h, h)),          # wo                  bf16
        full((L, h, inter)),      # wi                  bf16
        full((L, inter, h)),      # wf                  bf16
        full((L, 8, 128)),        # lvec (packed)       f32
        full((h, h)),             # pool_w              bf16
        full((h, 2 * nh)),        # fused head layer 1  bf16
        full((2 * nh, 128)),      # block-diag layer 2  bf16 (lane padded)
    ]
    out_specs = full((b, 128))

    grid_spec = pltpu.PrefetchScalarGridSpec(
        num_scalar_prefetch=0,
        grid=(1,),
        in_specs=in_specs,
        out_specs=out_specs,
    )
    kernel = functools.partial(_encoder_kernel, b, s, h, heads, hd, inter, nh, L)
    return pl.pallas_call(
        kernel,
        out_shape=jax.ShapeDtypeStruct((b, 128), jnp.float32),
        grid_spec=grid_spec,
        compiler_params=pltpu.CompilerParams(
            dimension_semantics=("arbitrary",)),
    )


# --------------------------- parameters --------------------------------------

def init_params(key, cfg):
    h, inter, nh, L = (cfg["hidden"], cfg["intermediate"],
                       cfg["num_hiddens"], cfg["layers"])
    keys = iter(jax.random.split(key, 64))

    def nrm(shape, scale=0.02):
        return (scale * jax.random.normal(next(keys), shape)).astype(jnp.float32)

    # ---- global packed vector tile: emb LN g/b, pooler b, fused head biases ----
    emb_ln_g = jnp.ones((h,), jnp.float32)
    emb_ln_b = jnp.zeros((h,), jnp.float32)
    pool_b = jnp.zeros((h,), jnp.float32)
    cls_b1 = jnp.zeros((nh,), jnp.float32)
    dom_b1 = jnp.zeros((nh,), jnp.float32)
    cls_b2 = jnp.zeros((2,), jnp.float32)
    dom_b2 = jnp.zeros((2,), jnp.float32)

    gvec = jnp.zeros((8, 128), jnp.float32)
    gvec = gvec.at[0, :h].set(emb_ln_g)
    gvec = gvec.at[1, :h].set(emb_ln_b)
    gvec = gvec.at[2, :h].set(pool_b)
    gvec = gvec.at[3, :nh].set(cls_b1)
    gvec = gvec.at[3, nh:2 * nh].set(dom_b1)
    gvec = gvec.at[4, 0:2].set(cls_b2)
    gvec = gvec.at[4, 2:4].set(dom_b2)

    # ---- per-layer packed vector tile: bqkv|bo|ln1_g|ln1_b|bi|bf|ln2_g|ln2_b ----
    lvec = jnp.zeros((L, 8, 128), jnp.float32)
    lvec = lvec.at[:, 2, :h].set(1.0)     # ln1 gamma
    lvec = lvec.at[:, 6, :h].set(1.0)     # ln2 gamma
    # (biases are zero-initialized, rows 0,1,3,4,5,7 stay zero)

    # ---- fused classifier heads ----
    cls_w1 = nrm((h, nh))
    dom_w1 = nrm((h, nh))
    w1 = jnp.concatenate([cls_w1, dom_w1], axis=1)            # (H, 2*nh)
    cls_w2 = nrm((nh, 2))
    dom_w2 = nrm((nh, 2))
    w2p = jnp.zeros((2 * nh, 128), jnp.float32)                # block-diag, lane padded
    w2p = w2p.at[:nh, 0:2].set(cls_w2)
    w2p = w2p.at[nh:, 2:4].set(dom_w2)

    return {
        # embedding tables (f32, gathered in JAX glue)
        "word_emb": nrm((cfg["vocab_size"], h)),
        "pos_emb": nrm((cfg["max_position"], h)),
        "type_emb": nrm((cfg["type_vocab"], h)),
        # packed vector tiles (f32)
        "gvec": gvec,
        "lvec": lvec,
        # matmul weights, pre-cast to bf16 in HBM (Q|K|V fused, layer-stacked)
        "wqkv": nrm((L, h, 3 * h)).astype(jnp.bfloat16),
        "wo": nrm((L, h, h)).astype(jnp.bfloat16),
        "wi": nrm((L, h, inter)).astype(jnp.bfloat16),
        "wf": nrm((L, inter, h)).astype(jnp.bfloat16),
        "pool_w": nrm((h, h)).astype(jnp.bfloat16),
        "w1": w1.astype(jnp.bfloat16),
        "w2p": w2p.astype(jnp.bfloat16),
    }


# --------------------------- forward pass -------------------------------------

def bert_dann_forward(params, cfg, input_ids, attention_mask, token_type_ids, alpha):
    b, s = input_ids.shape
    h = cfg["hidden"]

    # Embedding lookup (gather) stays in JAX glue.
    pos = jnp.arange(s)
    emb = (params["word_emb"][input_ids]
           + params["pos_emb"][pos][None, :, :]
           + params["type_emb"][token_type_ids]).reshape(b * s, h)

    # HF-style extended attention mask, pre-broadcast to (B, S, S).
    ext = (1.0 - attention_mask.astype(jnp.float32)) * -10000.0
    mask_b = jnp.broadcast_to(ext[:, None, :], (b, s, s))

    # ReverseLayerF.apply(x, alpha) is identity in the forward pass.
    del alpha

    call = make_encoder_call(cfg, b, s)
    out = call(emb, mask_b, params["gvec"],
               params["wqkv"], params["wo"], params["wi"], params["wf"],
               params["lvec"],
               params["pool_w"], params["w1"], params["w2p"])

    class_out = out[:, 0:2]
    domain_out = out[:, 2:4]
    return class_out, domain_out


# --------------------------- main ----------------------------------------------

if __name__ == "__main__":
    cfg = CFG
    params = init_params(jax.random.PRNGKey(0), cfg)

    batch, seq = 2, 8
    kid, _ = jax.random.split(jax.random.PRNGKey(0))
    input_ids = jax.random.randint(kid, (batch, seq), 0, cfg["vocab_size"],
                                   dtype=jnp.int32)
    attention_mask = jnp.ones((batch, seq), dtype=jnp.int32)
    token_type_ids = jnp.zeros((batch, seq), dtype=jnp.int32)
    alpha = 0.5

    class_out, domain_out = bert_dann_forward(
        params, cfg, input_ids, attention_mask, token_type_ids, alpha)
    jax.block_until_ready((class_out, domain_out))

    assert class_out.shape == (batch, 2)
    assert domain_out.shape == (batch, 2)
    assert jnp.all(jnp.isfinite(class_out)) and jnp.all(jnp.isfinite(domain_out))
    print("KERNEL_OK")
</pallas_src>

<mosaic_0001>
module attributes {stable_mosaic.version = 11 : i64} {
  func.func @_encoder_kernel(%arg0: i32, %arg1: memref<16x32xf32, #tpu.memory_space<vmem>>, %arg2: memref<2x8x8xf32, #tpu.memory_space<vmem>>, %arg3: memref<8x128xf32, #tpu.memory_space<vmem>>, %arg4: memref<2x32x96xbf16, #tpu.memory_space<vmem>>, %arg5: memref<2x32x32xbf16, #tpu.memory_space<vmem>>, %arg6: memref<2x32x64xbf16, #tpu.memory_space<vmem>>, %arg7: memref<2x64x32xbf16, #tpu.memory_space<vmem>>, %arg8: memref<2x8x128xf32, #tpu.memory_space<vmem>>, %arg9: memref<32x32xbf16, #tpu.memory_space<vmem>>, %arg10: memref<32x32xbf16, #tpu.memory_space<vmem>>, %arg11: memref<32x128xbf16, #tpu.memory_space<vmem>>, %arg12: memref<2x128xf32, #tpu.memory_space<vmem>>) attributes {dimension_semantics = [#tpu.dimension_semantics<arbitrary>], iteration_bounds = array<i64: 1>, scalar_prefetch = 0 : i64, scratch_operands = 0 : i64, tpu.core_type = #tpu.core_type<tc>, window_params = [{pipeline_mode = #tpu.pipeline_mode<synchronous>, transform_indices = @transform_0, window_bounds = array<i64: 16, 32>}, {pipeline_mode = #tpu.pipeline_mode<synchronous>, transform_indices = @transform_1, window_bounds = array<i64: 2, 8, 8>}, {pipeline_mode = #tpu.pipeline_mode<synchronous>, transform_indices = @transform_2, window_bounds = array<i64: 8, 128>}, {pipeline_mode = #tpu.pipeline_mode<synchronous>, transform_indices = @transform_3, window_bounds = array<i64: 2, 32, 96>}, {pipeline_mode = #tpu.pipeline_mode<synchronous>, transform_indices = @transform_4, window_bounds = array<i64: 2, 32, 32>}, {pipeline_mode = #tpu.pipeline_mode<synchronous>, transform_indices = @transform_5, window_bounds = array<i64: 2, 32, 64>}, {pipeline_mode = #tpu.pipeline_mode<synchronous>, transform_indices = @transform_6, window_bounds = array<i64: 2, 64, 32>}, {pipeline_mode = #tpu.pipeline_mode<synchronous>, transform_indices = @transform_7, window_bounds = array<i64: 2, 8, 128>}, {pipeline_mode = #tpu.pipeline_mode<synchronous>, transform_indices = @transform_8, window_bounds = array<i64: 32, 32>}, {pipeline_mode = #tpu.pipeline_mode<synchronous>, transform_indices = @transform_9, window_bounds = array<i64: 32, 32>}, {pipeline_mode = #tpu.pipeline_mode<synchronous>, transform_indices = @transform_10, window_bounds = array<i64: 32, 128>}, {pipeline_mode = #tpu.pipeline_mode<synchronous>, transform_indices = @transform_11, window_bounds = array<i64: 2, 128>}]} {
    %c0 = arith.constant 0 : index
    %c0_0 = arith.constant 0 : index
    %0 = vector.load %arg3[%c0, %c0_0] : memref<8x128xf32, #tpu.memory_space<vmem>>, vector<8x128xf32>
    %1 = vector.extract_strided_slice %0 {offsets = [0, 0], sizes = [1, 32], strides = [1, 1]} : vector<8x128xf32> to vector<1x32xf32>
    %2 = vector.extract_strided_slice %0 {offsets = [1, 0], sizes = [1, 32], strides = [1, 1]} : vector<8x128xf32> to vector<1x32xf32>
    %3 = vector.extract_strided_slice %0 {offsets = [2, 0], sizes = [1, 32], strides = [1, 1]} : vector<8x128xf32> to vector<1x32xf32>
    %4 = vector.extract_strided_slice %0 {offsets = [3, 0], sizes = [1, 32], strides = [1, 1]} : vector<8x128xf32> to vector<1x32xf32>
    %5 = vector.extract_strided_slice %0 {offsets = [4, 0], sizes = [1, 128], strides = [1, 1]} : vector<8x128xf32> to vector<1x128xf32>
    %c0_1 = arith.constant 0 : index
    %c0_2 = arith.constant 0 : index
    %c0_3 = arith.constant 0 : index
    %6 = vector.load %arg2[%c0_1, %c0_2, %c0_3] : memref<2x8x8xf32, #tpu.memory_space<vmem>>, vector<2x8x8xf32>
    %c0_4 = arith.constant 0 : index
    %c0_5 = arith.constant 0 : index
    %7 = vector.load %arg1[%c0_4, %c0_5] : memref<16x32xf32, #tpu.memory_space<vmem>>, vector<16x32xf32>
    %cst = arith.constant dense<0.000000e+00> : vector<16xf32>
    %8 = vector.multi_reduction <add>, %7, %cst [1] : vector<16x32xf32> to vector<16xf32>
    %9 = vector.shape_cast %8 : vector<16xf32> to vector<16x1xf32>
    %cst_6 = arith.constant 3.200000e+01 : f32
    %10 = vector.broadcast %cst_6 : f32 to vector<16x1xf32>
    %11 = arith.divf %9, %10 : vector<16x1xf32>
    %12 = vector.broadcast %11 : vector<16x1xf32> to vector<16x32xf32>
    %13 = arith.subf %7, %12 : vector<16x32xf32>
    %14 = arith.mulf %13, %13 : vector<16x32xf32>
    %cst_7 = arith.constant dense<0.000000e+00> : vector<16xf32>
    %15 = vector.multi_reduction <add>, %14, %cst_7 [1] : vector<16x32xf32> to vector<16xf32>
    %16 = vector.shape_cast %15 : vector<16xf32> to vector<16x1xf32>
    %cst_8 = arith.constant 3.200000e+01 : f32
    %17 = vector.broadcast %cst_8 : f32 to vector<16x1xf32>
    %18 = arith.divf %16, %17 : vector<16x1xf32>
    %cst_9 = arith.constant 9.99999996E-13 : f32
    %19 = vector.broadcast %cst_9 : f32 to vector<16x1xf32>
    %20 = arith.addf %18, %19 : vector<16x1xf32>
    %21 = math.rsqrt %20 : vector<16x1xf32>
    %22 = vector.broadcast %21 : vector<16x1xf32> to vector<16x32xf32>
    %23 = arith.mulf %13, %22 : vector<16x32xf32>
    %24 = vector.broadcast %1 : vector<1x32xf32> to vector<16x32xf32>
    %25 = arith.mulf %23, %24 : vector<16x32xf32>
    %26 = vector.broadcast %2 : vector<1x32xf32> to vector<16x32xf32>
    %27 = arith.addf %25, %26 : vector<16x32xf32>
    %c0_10 = arith.constant 0 : index
    %c0_11 = arith.constant 0 : index
    %c0_12 = arith.constant 0 : index
    %28 = vector.load %arg8[%c0_10, %c0_11, %c0_12] : memref<2x8x128xf32, #tpu.memory_space<vmem>>, vector<1x8x128xf32>
    %29 = vector.shape_cast %28 : vector<1x8x128xf32> to vector<8x128xf32>
    %30 = vector.extract_strided_slice %29 {offsets = [0, 0], sizes = [1, 96], strides = [1, 1]} : vector<8x128xf32> to vector<1x96xf32>
    %31 = vector.extract_strided_slice %29 {offsets = [1, 0], sizes = [1, 32], strides = [1, 1]} : vector<8x128xf32> to vector<1x32xf32>
    %32 = vector.extract_strided_slice %29 {offsets = [2, 0], sizes = [1, 32], strides = [1, 1]} : vector<8x128xf32> to vector<1x32xf32>
    %33 = vector.extract_strided_slice %29 {offsets = [3, 0], sizes = [1, 32], strides = [1, 1]} : vector<8x128xf32> to vector<1x32xf32>
    %34 = vector.extract_strided_slice %29 {offsets = [4, 0], sizes = [1, 64], strides = [1, 1]} : vector<8x128xf32> to vector<1x64xf32>
    %35 = vector.extract_strided_slice %29 {offsets = [5, 0], sizes = [1, 32], strides = [1, 1]} : vector<8x128xf32> to vector<1x32xf32>
    %36 = vector.extract_strided_slice %29 {offsets = [6, 0], sizes = [1, 32], strides = [1, 1]} : vector<8x128xf32> to vector<1x32xf32>
    %37 = vector.extract_strided_slice %29 {offsets = [7, 0], sizes = [1, 32], strides = [1, 1]} : vector<8x128xf32> to vector<1x32xf32>
    %c0_13 = arith.constant 0 : index
    %c0_14 = arith.constant 0 : index
    %c0_15 = arith.constant 0 : index
    %38 = vector.load %arg4[%c0_13, %c0_14, %c0_15] : memref<2x32x96xbf16, #tpu.memory_space<vmem>>, vector<1x32x96xbf16>
    %39 = vector.shape_cast %38 : vector<1x32x96xbf16> to vector<32x96xbf16>
    %40 = arith.truncf %27 : vector<16x32xf32> to vector<16x32xbf16>
    %cst_16 = arith.constant dense<0.000000e+00> : vector<16x96xf32>
    %41 = tpu.matmul %40, %39, %cst_16 {dimension_numbers = #tpu.dot_dimension_numbers<[1], [0], [0], [1], [0, 0, 1, 1], [], []>} : vector<16x32xbf16>, vector<32x96xbf16>, vector<16x96xf32> -> vector<16x96xf32>
    %42 = vector.broadcast %30 : vector<1x96xf32> to vector<16x96xf32>
    %43 = arith.addf %41, %42 : vector<16x96xf32>
    %44 = vector.extract_strided_slice %43 {offsets = [0, 0], sizes = [16, 16], strides = [1, 1]} : vector<16x96xf32> to vector<16x16xf32>
    %45 = vector.shape_cast %44 : vector<16x16xf32> to vector<2x8x16xf32>
    %46 = vector.extract_strided_slice %43 {offsets = [0, 32], sizes = [16, 16], strides = [1, 1]} : vector<16x96xf32> to vector<16x16xf32>
    %47 = vector.shape_cast %46 : vector<16x16xf32> to vector<2x8x16xf32>
    %48 = vector.extract_strided_slice %43 {offsets = [0, 64], sizes = [16, 16], strides = [1, 1]} : vector<16x96xf32> to vector<16x16xf32>
    %49 = vector.shape_cast %48 : vector<16x16xf32> to vector<2x8x16xf32>
    %50 = arith.truncf %45 : vector<2x8x16xf32> to vector<2x8x16xbf16>
    %51 = arith.truncf %47 : vector<2x8x16xf32> to vector<2x8x16xbf16>
    "tpu.trace_start"() <{level = 10 : i32, message = "bqd,bkd->bqk"}> : () -> ()
    %cst_17 = arith.constant dense<0.000000e+00> : vector<2x8x8xf32>
    %52 = tpu.matmul %50, %51, %cst_17 {dimension_numbers = #tpu.dot_dimension_numbers<[2], [2], [1], [1], [0, 0, 0, 1, 1, 1], [0], [0]>} : vector<2x8x16xbf16>, vector<2x8x16xbf16>, vector<2x8x8xf32> -> vector<2x8x8xf32>
    "tpu.trace_stop"() : () -> ()
    %cst_18 = arith.constant 2.500000e-01 : f32
    %53 = vector.broadcast %cst_18 : f32 to vector<2x8x8xf32>
    %54 = arith.mulf %52, %53 : vector<2x8x8xf32>
    %55 = arith.addf %54, %6 : vector<2x8x8xf32>
    %cst_19 = arith.constant dense<0xFF800000> : vector<2x8xf32>
    %56 = vector.multi_reduction <maximumf>, %55, %cst_19 [2] : vector<2x8x8xf32> to vector<2x8xf32>
    %57 = vector.shape_cast %56 : vector<2x8xf32> to vector<2x8x1xf32>
    %58 = vector.broadcast %57 : vector<2x8x1xf32> to vector<2x8x8xf32>
    %59 = arith.subf %55, %58 : vector<2x8x8xf32>
    %60 = math.exp %59 : vector<2x8x8xf32>
    %cst_20 = arith.constant dense<0.000000e+00> : vector<2x8xf32>
    %61 = vector.multi_reduction <add>, %60, %cst_20 [2] : vector<2x8x8xf32> to vector<2x8xf32>
    %62 = vector.shape_cast %61 : vector<2x8xf32> to vector<2x8x1xf32>
    %63 = tpu.reciprocal %62 {approx = true} : vector<2x8x1xf32> -> vector<2x8x1xf32>
    %64 = vector.broadcast %63 : vector<2x8x1xf32> to vector<2x8x8xf32>
    %65 = arith.mulf %60, %64 : vector<2x8x8xf32>
    %66 = arith.truncf %65 : vector<2x8x8xf32> to vector<2x8x8xbf16>
    %67 = arith.truncf %49 : vector<2x8x16xf32> to vector<2x8x16xbf16>
    "tpu.trace_start"() <{level = 10 : i32, message = "bqk,bkd->bqd"}> : () -> ()
    %cst_21 = arith.constant dense<0.000000e+00> : vector<2x8x16xf32>
    %68 = tpu.matmul %66, %67, %cst_21 {dimension_numbers = #tpu.dot_dimension_numbers<[2], [1], [1], [2], [0, 0, 0, 1, 1, 2], [0], [0]>} : vector<2x8x8xbf16>, vector<2x8x16xbf16>, vector<2x8x16xf32> -> vector<2x8x16xf32>
    "tpu.trace_stop"() : () -> ()
    %69 = vector.shape_cast %68 : vector<2x8x16xf32> to vector<16x16xf32>
    %70 = vector.extract_strided_slice %43 {offsets = [0, 16], sizes = [16, 16], strides = [1, 1]} : vector<16x96xf32> to vector<16x16xf32>
    %71 = vector.shape_cast %70 : vector<16x16xf32> to vector<2x8x16xf32>
    %72 = vector.extract_strided_slice %43 {offsets = [0, 48], sizes = [16, 16], strides = [1, 1]} : vector<16x96xf32> to vector<16x16xf32>
    %73 = vector.shape_cast %72 : vector<16x16xf32> to vector<2x8x16xf32>
    %74 = vector.extract_strided_slice %43 {offsets = [0, 80], sizes = [16, 16], strides = [1, 1]} : vector<16x96xf32> to vector<16x16xf32>
    %75 = vector.shape_cast %74 : vector<16x16xf32> to vector<2x8x16xf32>
    %76 = arith.truncf %71 : vector<2x8x16xf32> to vector<2x8x16xbf16>
    %77 = arith.truncf %73 : vector<2x8x16xf32> to vector<2x8x16xbf16>
    "tpu.trace_start"() <{level = 10 : i32, message = "bqd,bkd->bqk"}> : () -> ()
    %cst_22 = arith.constant dense<0.000000e+00> : vector<2x8x8xf32>
    %78 = tpu.matmul %76, %77, %cst_22 {dimension_numbers = #tpu.dot_dimension_numbers<[2], [2], [1], [1], [0, 0, 0, 1, 1, 1], [0], [0]>} : vector<2x8x16xbf16>, vector<2x8x16xbf16>, vector<2x8x8xf32> -> vector<2x8x8xf32>
    "tpu.trace_stop"() : () -> ()
    %cst_23 = arith.constant 2.500000e-01 : f32
    %79 = vector.broadcast %cst_23 : f32 to vector<2x8x8xf32>
    %80 = arith.mulf %78, %79 : vector<2x8x8xf32>
    %81 = arith.addf %80, %6 : vector<2x8x8xf32>
    %cst_24 = arith.constant dense<0xFF800000> : vector<2x8xf32>
    %82 = vector.multi_reduction <maximumf>, %81, %cst_24 [2] : vector<2x8x8xf32> to vector<2x8xf32>
    %83 = vector.shape_cast %82 : vector<2x8xf32> to vector<2x8x1xf32>
    %84 = vector.broadcast %83 : vector<2x8x1xf32> to vector<2x8x8xf32>
    %85 = arith.subf %81, %84 : vector<2x8x8xf32>
    %86 = math.exp %85 : vector<2x8x8xf32>
    %cst_25 = arith.constant dense<0.000000e+00> : vector<2x8xf32>
    %87 = vector.multi_reduction <add>, %86, %cst_25 [2] : vector<2x8x8xf32> to vector<2x8xf32>
    %88 = vector.shape_cast %87 : vector<2x8xf32> to vector<2x8x1xf32>
    %89 = tpu.reciprocal %88 {approx = true} : vector<2x8x1xf32> -> vector<2x8x1xf32>
    %90 = vector.broadcast %89 : vector<2x8x1xf32> to vector<2x8x8xf32>
    %91 = arith.mulf %86, %90 : vector<2x8x8xf32>
    %92 = arith.truncf %91 : vector<2x8x8xf32> to vector<2x8x8xbf16>
    %93 = arith.truncf %75 : vector<2x8x16xf32> to vector<2x8x16xbf16>
    "tpu.trace_start"() <{level = 10 : i32, message = "bqk,bkd->bqd"}> : () -> ()
    %cst_26 = arith.constant dense<0.000000e+00> : vector<2x8x16xf32>
    %94 = tpu.matmul %92, %93, %cst_26 {dimension_numbers = #tpu.dot_dimension_numbers<[2], [1], [1], [2], [0, 0, 0, 1, 1, 2], [0], [0]>} : vector<2x8x8xbf16>, vector<2x8x16xbf16>, vector<2x8x16xf32> -> vector<2x8x16xf32>
    "tpu.trace_stop"() : () -> ()
    %95 = vector.shape_cast %94 : vector<2x8x16xf32> to vector<16x16xf32>
    %96 = tpu.concatenate %69, %95 in 1 : vector<16x16xf32>, vector<16x16xf32> -> vector<16x32xf32>
    %c0_27 = arith.constant 0 : index
    %c0_28 = arith.constant 0 : index
    %c0_29 = arith.constant 0 : index
    %97 = vector.load %arg5[%c0_27, %c0_28, %c0_29] : memref<2x32x32xbf16, #tpu.memory_space<vmem>>, vector<1x32x32xbf16>
    %98 = vector.shape_cast %97 : vector<1x32x32xbf16> to vector<32x32xbf16>
    %99 = arith.truncf %96 : vector<16x32xf32> to vector<16x32xbf16>
    %cst_30 = arith.constant dense<0.000000e+00> : vector<16x32xf32>
    %100 = tpu.matmul %99, %98, %cst_30 {dimension_numbers = #tpu.dot_dimension_numbers<[1], [0], [0], [1], [0, 0, 1, 1], [], []>} : vector<16x32xbf16>, vector<32x32xbf16>, vector<16x32xf32> -> vector<16x32xf32>
    %101 = vector.broadcast %31 : vector<1x32xf32> to vector<16x32xf32>
    %102 = arith.addf %100, %101 : vector<16x32xf32>
    %103 = arith.addf %102, %27 : vector<16x32xf32>
    %cst_31 = arith.constant dense<0.000000e+00> : vector<16xf32>
    %104 = vector.multi_reduction <add>, %103, %cst_31 [1] : vector<16x32xf32> to vector<16xf32>
    %105 = vector.shape_cast %104 : vector<16xf32> to vector<16x1xf32>
    %cst_32 = arith.constant 3.200000e+01 : f32
    %106 = vector.broadcast %cst_32 : f32 to vector<16x1xf32>
    %107 = arith.divf %105, %106 : vector<16x1xf32>
    %108 = vector.broadcast %107 : vector<16x1xf32> to vector<16x32xf32>
    %109 = arith.subf %103, %108 : vector<16x32xf32>
    %110 = arith.mulf %109, %109 : vector<16x32xf32>
    %cst_33 = arith.constant dense<0.000000e+00> : vector<16xf32>
    %111 = vector.multi_reduction <add>, %110, %cst_33 [1] : vector<16x32xf32> to vector<16xf32>
    %112 = vector.shape_cast %111 : vector<16xf32> to vector<16x1xf32>
    %cst_34 = arith.constant 3.200000e+01 : f32
    %113 = vector.broadcast %cst_34 : f32 to vector<16x1xf32>
    %114 = arith.divf %112, %113 : vector<16x1xf32>
    %cst_35 = arith.constant 9.99999996E-13 : f32
    %115 = vector.broadcast %cst_35 : f32 to vector<16x1xf32>
    %116 = arith.addf %114, %115 : vector<16x1xf32>
    %117 = math.rsqrt %116 : vector<16x1xf32>
    %118 = vector.broadcast %117 : vector<16x1xf32> to vector<16x32xf32>
    %119 = arith.mulf %109, %118 : vector<16x32xf32>
    %120 = vector.broadcast %32 : vector<1x32xf32> to vector<16x32xf32>
    %121 = arith.mulf %119, %120 : vector<16x32xf32>
    %122 = vector.broadcast %33 : vector<1x32xf32> to vector<16x32xf32>
    %123 = arith.addf %121, %122 : vector<16x32xf32>
    %c0_36 = arith.constant 0 : index
    %c0_37 = arith.constant 0 : index
    %c0_38 = arith.constant 0 : index
    %124 = vector.load %arg6[%c0_36, %c0_37, %c0_38] : memref<2x32x64xbf16, #tpu.memory_space<vmem>>, vector<1x32x64xbf16>
    %125 = vector.shape_cast %124 : vector<1x32x64xbf16> to vector<32x64xbf16>
    %126 = arith.truncf %123 : vector<16x32xf32> to vector<16x32xbf16>
    %cst_39 = arith.constant dense<0.000000e+00> : vector<16x64xf32>
    %127 = tpu.matmul %126, %125, %cst_39 {dimension_numbers = #tpu.dot_dimension_numbers<[1], [0], [0], [1], [0, 0, 1, 1], [], []>} : vector<16x32xbf16>, vector<32x64xbf16>, vector<16x64xf32> -> vector<16x64xf32>
    %128 = vector.broadcast %34 : vector<1x64xf32> to vector<16x64xf32>
    %129 = arith.addf %127, %128 : vector<16x64xf32>
    %130 = arith.mulf %129, %129 : vector<16x64xf32>
    %131 = arith.mulf %129, %130 : vector<16x64xf32>
    %cst_40 = arith.constant 4.471500e-02 : f32
    %132 = vector.broadcast %cst_40 : f32 to vector<16x64xf32>
    %133 = arith.mulf %132, %131 : vector<16x64xf32>
    %134 = arith.addf %129, %133 : vector<16x64xf32>
    %cst_41 = arith.constant 0.797884583 : f32
    %135 = vector.broadcast %cst_41 : f32 to vector<16x64xf32>
    %136 = arith.mulf %135, %134 : vector<16x64xf32>
    %137 = math.tanh %136 : vector<16x64xf32>
    %cst_42 = arith.constant 1.000000e+00 : f32
    %138 = vector.broadcast %cst_42 : f32 to vector<16x64xf32>
    %139 = arith.addf %138, %137 : vector<16x64xf32>
    %cst_43 = arith.constant 5.000000e-01 : f32
    %140 = vector.broadcast %cst_43 : f32 to vector<16x64xf32>
    %141 = arith.mulf %140, %139 : vector<16x64xf32>
    %142 = arith.mulf %129, %141 : vector<16x64xf32>
    %c0_44 = arith.constant 0 : index
    %c0_45 = arith.constant 0 : index
    %c0_46 = arith.constant 0 : index
    %143 = vector.load %arg7[%c0_44, %c0_45, %c0_46] : memref<2x64x32xbf16, #tpu.memory_space<vmem>>, vector<1x64x32xbf16>
    %144 = vector.shape_cast %143 : vector<1x64x32xbf16> to vector<64x32xbf16>
    %145 = arith.truncf %142 : vector<16x64xf32> to vector<16x64xbf16>
    %cst_47 = arith.constant dense<0.000000e+00> : vector<16x32xf32>
    %146 = tpu.matmul %145, %144, %cst_47 {dimension_numbers = #tpu.dot_dimension_numbers<[1], [0], [0], [1], [0, 0, 1, 1], [], []>} : vector<16x64xbf16>, vector<64x32xbf16>, vector<16x32xf32> -> vector<16x32xf32>
    %147 = vector.broadcast %35 : vector<1x32xf32> to vector<16x32xf32>
    %148 = arith.addf %146, %147 : vector<16x32xf32>
    %149 = arith.addf %148, %123 : vector<16x32xf32>
    %cst_48 = arith.constant dense<0.000000e+00> : vector<16xf32>
    %150 = vector.multi_reduction <add>, %149, %cst_48 [1] : vector<16x32xf32> to vector<16xf32>
    %151 = vector.shape_cast %150 : vector<16xf32> to vector<16x1xf32>
    %cst_49 = arith.constant 3.200000e+01 : f32
    %152 = vector.broadcast %cst_49 : f32 to vector<16x1xf32>
    %153 = arith.divf %151, %152 : vector<16x1xf32>
    %154 = vector.broadcast %153 : vector<16x1xf32> to vector<16x32xf32>
    %155 = arith.subf %149, %154 : vector<16x32xf32>
    %156 = arith.mulf %155, %155 : vector<16x32xf32>
    %cst_50 = arith.constant dense<0.000000e+00> : vector<16xf32>
    %157 = vector.multi_reduction <add>, %156, %cst_50 [1] : vector<16x32xf32> to vector<16xf32>
    %158 = vector.shape_cast %157 : vector<16xf32> to vector<16x1xf32>
    %cst_51 = arith.constant 3.200000e+01 : f32
    %159 = vector.broadcast %cst_51 : f32 to vector<16x1xf32>
    %160 = arith.divf %158, %159 : vector<16x1xf32>
    %cst_52 = arith.constant 9.99999996E-13 : f32
    %161 = vector.broadcast %cst_52 : f32 to vector<16x1xf32>
    %162 = arith.addf %160, %161 : vector<16x1xf32>
    %163 = math.rsqrt %162 : vector<16x1xf32>
    %164 = vector.broadcast %163 : vector<16x1xf32> to vector<16x32xf32>
    %165 = arith.mulf %155, %164 : vector<16x32xf32>
    %166 = vector.broadcast %36 : vector<1x32xf32> to vector<16x32xf32>
    %167 = arith.mulf %165, %166 : vector<16x32xf32>
    %168 = vector.broadcast %37 : vector<1x32xf32> to vector<16x32xf32>
    %169 = arith.addf %167, %168 : vector<16x32xf32>
    %c1 = arith.constant 1 : index
    %c0_53 = arith.constant 0 : index
    %c0_54 = arith.constant 0 : index
    %170 = vector.load %arg8[%c1, %c0_53, %c0_54] : memref<2x8x128xf32, #tpu.memory_space<vmem>>, vector<1x8x128xf32>
    %171 = vector.shape_cast %170 : vector<1x8x128xf32> to vector<8x128xf32>
    %172 = vector.extract_strided_slice %171 {offsets = [0, 0], sizes = [1, 96], strides = [1, 1]} : vector<8x128xf32> to vector<1x96xf32>
    %173 = vector.extract_strided_slice %171 {offsets = [1, 0], sizes = [1, 32], strides = [1, 1]} : vector<8x128xf32> to vector<1x32xf32>
    %174 = vector.extract_strided_slice %171 {offsets = [2, 0], sizes = [1, 32], strides = [1, 1]} : vector<8x128xf32> to vector<1x32xf32>
    %175 = vector.extract_strided_slice %171 {offsets = [3, 0], sizes = [1, 32], strides = [1, 1]} : vector<8x128xf32> to vector<1x32xf32>
    %176 = vector.extract_strided_slice %171 {offsets = [4, 0], sizes = [1, 64], strides = [1, 1]} : vector<8x128xf32> to vector<1x64xf32>
    %177 = vector.extract_strided_slice %171 {offsets = [5, 0], sizes = [1, 32], strides = [1, 1]} : vector<8x128xf32> to vector<1x32xf32>
    %178 = vector.extract_strided_slice %171 {offsets = [6, 0], sizes = [1, 32], strides = [1, 1]} : vector<8x128xf32> to vector<1x32xf32>
    %179 = vector.extract_strided_slice %171 {offsets = [7, 0], sizes = [1, 32], strides = [1, 1]} : vector<8x128xf32> to vector<1x32xf32>
    %c1_55 = arith.constant 1 : index
    %c0_56 = arith.constant 0 : index
    %c0_57 = arith.constant 0 : index
    %180 = vector.load %arg4[%c1_55, %c0_56, %c0_57] : memref<2x32x96xbf16, #tpu.memory_space<vmem>>, vector<1x32x96xbf16>
    %181 = vector.shape_cast %180 : vector<1x32x96xbf16> to vector<32x96xbf16>
    %182 = arith.truncf %169 : vector<16x32xf32> to vector<16x32xbf16>
    %cst_58 = arith.constant dense<0.000000e+00> : vector<16x96xf32>
    %183 = tpu.matmul %182, %181, %cst_58 {dimension_numbers = #tpu.dot_dimension_numbers<[1], [0], [0], [1], [0, 0, 1, 1], [], []>} : vector<16x32xbf16>, vector<32x96xbf16>, vector<16x96xf32> -> vector<16x96xf32>
    %184 = vector.broadcast %172 : vector<1x96xf32> to vector<16x96xf32>
    %185 = arith.addf %183, %184 : vector<16x96xf32>
    %186 = vector.extract_strided_slice %185 {offsets = [0, 0], sizes = [16, 16], strides = [1, 1]} : vector<16x96xf32> to vector<16x16xf32>
    %187 = vector.shape_cast %186 : vector<16x16xf32> to vector<2x8x16xf32>
    %188 = vector.extract_strided_slice %185 {offsets = [0, 32], sizes = [16, 16], strides = [1, 1]} : vector<16x96xf32> to vector<16x16xf32>
    %189 = vector.shape_cast %188 : vector<16x16xf32> to vector<2x8x16xf32>
    %190 = vector.extract_strided_slice %185 {offsets = [0, 64], sizes = [16, 16], strides = [1, 1]} : vector<16x96xf32> to vector<16x16xf32>
    %191 = vector.shape_cast %190 : vector<16x16xf32> to vector<2x8x16xf32>
    %192 = arith.truncf %187 : vector<2x8x16xf32> to vector<2x8x16xbf16>
    %193 = arith.truncf %189 : vector<2x8x16xf32> to vector<2x8x16xbf16>
    "tpu.trace_start"() <{level = 10 : i32, message = "bqd,bkd->bqk"}> : () -> ()
    %cst_59 = arith.constant dense<0.000000e+00> : vector<2x8x8xf32>
    %194 = tpu.matmul %192, %193, %cst_59 {dimension_numbers = #tpu.dot_dimension_numbers<[2], [2], [1], [1], [0, 0, 0, 1, 1, 1], [0], [0]>} : vector<2x8x16xbf16>, vector<2x8x16xbf16>, vector<2x8x8xf32> -> vector<2x8x8xf32>
    "tpu.trace_stop"() : () -> ()
    %cst_60 = arith.constant 2.500000e-01 : f32
    %195 = vector.broadcast %cst_60 : f32 to vector<2x8x8xf32>
    %196 = arith.mulf %194, %195 : vector<2x8x8xf32>
    %197 = arith.addf %196, %6 : vector<2x8x8xf32>
    %cst_61 = arith.constant dense<0xFF800000> : vector<2x8xf32>
    %198 = vector.multi_reduction <maximumf>, %197, %cst_61 [2] : vector<2x8x8xf32> to vector<2x8xf32>
    %199 = vector.shape_cast %198 : vector<2x8xf32> to vector<2x8x1xf32>
    %200 = vector.broadcast %199 : vector<2x8x1xf32> to vector<2x8x8xf32>
    %201 = arith.subf %197, %200 : vector<2x8x8xf32>
    %202 = math.exp %201 : vector<2x8x8xf32>
    %cst_62 = arith.constant dense<0.000000e+00> : vector<2x8xf32>
    %203 = vector.multi_reduction <add>, %202, %cst_62 [2] : vector<2x8x8xf32> to vector<2x8xf32>
    %204 = vector.shape_cast %203 : vector<2x8xf32> to vector<2x8x1xf32>
    %205 = tpu.reciprocal %204 {approx = true} : vector<2x8x1xf32> -> vector<2x8x1xf32>
    %206 = vector.broadcast %205 : vector<2x8x1xf32> to vector<2x8x8xf32>
    %207 = arith.mulf %202, %206 : vector<2x8x8xf32>
    %208 = arith.truncf %207 : vector<2x8x8xf32> to vector<2x8x8xbf16>
    %209 = arith.truncf %191 : vector<2x8x16xf32> to vector<2x8x16xbf16>
    "tpu.trace_start"() <{level = 10 : i32, message = "bqk,bkd->bqd"}> : () -> ()
    %cst_63 = arith.constant dense<0.000000e+00> : vector<2x8x16xf32>
    %210 = tpu.matmul %208, %209, %cst_63 {dimension_numbers = #tpu.dot_dimension_numbers<[2], [1], [1], [2], [0, 0, 0, 1, 1, 2], [0], [0]>} : vector<2x8x8xbf16>, vector<2x8x16xbf16>, vector<2x8x16xf32> -> vector<2x8x16xf32>
    "tpu.trace_stop"() : () -> ()
    %211 = vector.shape_cast %210 : vector<2x8x16xf32> to vector<16x16xf32>
    %212 = vector.extract_strided_slice %185 {offsets = [0, 16], sizes = [16, 16], strides = [1, 1]} : vector<16x96xf32> to vector<16x16xf32>
    %213 = vector.shape_cast %212 : vector<16x16xf32> to vector<2x8x16xf32>
    %214 = vector.extract_strided_slice %185 {offsets = [0, 48], sizes = [16, 16], strides = [1, 1]} : vector<16x96xf32> to vector<16x16xf32>
    %215 = vector.shape_cast %214 : vector<16x16xf32> to vector<2x8x16xf32>
    %216 = vector.extract_strided_slice %185 {offsets = [0, 80], sizes = [16, 16], strides = [1, 1]} : vector<16x96xf32> to vector<16x16xf32>
    %217 = vector.shape_cast %216 : vector<16x16xf32> to vector<2x8x16xf32>
    %218 = arith.truncf %213 : vector<2x8x16xf32> to vector<2x8x16xbf16>
    %219 = arith.truncf %215 : vector<2x8x16xf32> to vector<2x8x16xbf16>
    "tpu.trace_start"() <{level = 10 : i32, message = "bqd,bkd->bqk"}> : () -> ()
    %cst_64 = arith.constant dense<0.000000e+00> : vector<2x8x8xf32>
    %220 = tpu.matmul %218, %219, %cst_64 {dimension_numbers = #tpu.dot_dimension_numbers<[2], [2], [1], [1], [0, 0, 0, 1, 1, 1], [0], [0]>} : vector<2x8x16xbf16>, vector<2x8x16xbf16>, vector<2x8x8xf32> -> vector<2x8x8xf32>
    "tpu.trace_stop"() : () -> ()
    %cst_65 = arith.constant 2.500000e-01 : f32
    %221 = vector.broadcast %cst_65 : f32 to vector<2x8x8xf32>
    %222 = arith.mulf %220, %221 : vector<2x8x8xf32>
    %223 = arith.addf %222, %6 : vector<2x8x8xf32>
    %cst_66 = arith.constant dense<0xFF800000> : vector<2x8xf32>
    %224 = vector.multi_reduction <maximumf>, %223, %cst_66 [2] : vector<2x8x8xf32> to vector<2x8xf32>
    %225 = vector.shape_cast %224 : vector<2x8xf32> to vector<2x8x1xf32>
    %226 = vector.broadcast %225 : vector<2x8x1xf32> to vector<2x8x8xf32>
    %227 = arith.subf %223, %226 : vector<2x8x8xf32>
    %228 = math.exp %227 : vector<2x8x8xf32>
    %cst_67 = arith.constant dense<0.000000e+00> : vector<2x8xf32>
    %229 = vector.multi_reduction <add>, %228, %cst_67 [2] : vector<2x8x8xf32> to vector<2x8xf32>
    %230 = vector.shape_cast %229 : vector<2x8xf32> to vector<2x8x1xf32>
    %231 = tpu.reciprocal %230 {approx = true} : vector<2x8x1xf32> -> vector<2x8x1xf32>
    %232 = vector.broadcast %231 : vector<2x8x1xf32> to vector<2x8x8xf32>
    %233 = arith.mulf %228, %232 : vector<2x8x8xf32>
    %234 = arith.truncf %233 : vector<2x8x8xf32> to vector<2x8x8xbf16>
    %235 = arith.truncf %217 : vector<2x8x16xf32> to vector<2x8x16xbf16>
    "tpu.trace_start"() <{level = 10 : i32, message = "bqk,bkd->bqd"}> : () -> ()
    %cst_68 = arith.constant dense<0.000000e+00> : vector<2x8x16xf32>
    %236 = tpu.matmul %234, %235, %cst_68 {dimension_numbers = #tpu.dot_dimension_numbers<[2], [1], [1], [2], [0, 0, 0, 1, 1, 2], [0], [0]>} : vector<2x8x8xbf16>, vector<2x8x16xbf16>, vector<2x8x16xf32> -> vector<2x8x16xf32>
    "tpu.trace_stop"() : () -> ()
    %237 = vector.shape_cast %236 : vector<2x8x16xf32> to vector<16x16xf32>
    %238 = tpu.concatenate %211, %237 in 1 : vector<16x16xf32>, vector<16x16xf32> -> vector<16x32xf32>
    %c1_69 = arith.constant 1 : index
    %c0_70 = arith.constant 0 : index
    %c0_71 = arith.constant 0 : index
    %239 = vector.load %arg5[%c1_69, %c0_70, %c0_71] : memref<2x32x32xbf16, #tpu.memory_space<vmem>>, vector<1x32x32xbf16>
    %240 = vector.shape_cast %239 : vector<1x32x32xbf16> to vector<32x32xbf16>
    %241 = arith.truncf %238 : vector<16x32xf32> to vector<16x32xbf16>
    %cst_72 = arith.constant dense<0.000000e+00> : vector<16x32xf32>
    %242 = tpu.matmul %241, %240, %cst_72 {dimension_numbers = #tpu.dot_dimension_numbers<[1], [0], [0], [1], [0, 0, 1, 1], [], []>} : vector<16x32xbf16>, vector<32x32xbf16>, vector<16x32xf32> -> vector<16x32xf32>
    %243 = vector.broadcast %173 : vector<1x32xf32> to vector<16x32xf32>
    %244 = arith.addf %242, %243 : vector<16x32xf32>
    %245 = arith.addf %244, %169 : vector<16x32xf32>
    %cst_73 = arith.constant dense<0.000000e+00> : vector<16xf32>
    %246 = vector.multi_reduction <add>, %245, %cst_73 [1] : vector<16x32xf32> to vector<16xf32>
    %247 = vector.shape_cast %246 : vector<16xf32> to vector<16x1xf32>
    %cst_74 = arith.constant 3.200000e+01 : f32
    %248 = vector.broadcast %cst_74 : f32 to vector<16x1xf32>
    %249 = arith.divf %247, %248 : vector<16x1xf32>
    %250 = vector.broadcast %249 : vector<16x1xf32> to vector<16x32xf32>
    %251 = arith.subf %245, %250 : vector<16x32xf32>
    %252 = arith.mulf %251, %251 : vector<16x32xf32>
    %cst_75 = arith.constant dense<0.000000e+00> : vector<16xf32>
    %253 = vector.multi_reduction <add>, %252, %cst_75 [1] : vector<16x32xf32> to vector<16xf32>
    %254 = vector.shape_cast %253 : vector<16xf32> to vector<16x1xf32>
    %cst_76 = arith.constant 3.200000e+01 : f32
    %255 = vector.broadcast %cst_76 : f32 to vector<16x1xf32>
    %256 = arith.divf %254, %255 : vector<16x1xf32>
    %cst_77 = arith.constant 9.99999996E-13 : f32
    %257 = vector.broadcast %cst_77 : f32 to vector<16x1xf32>
    %258 = arith.addf %256, %257 : vector<16x1xf32>
    %259 = math.rsqrt %258 : vector<16x1xf32>
    %260 = vector.broadcast %259 : vector<16x1xf32> to vector<16x32xf32>
    %261 = arith.mulf %251, %260 : vector<16x32xf32>
    %262 = vector.broadcast %174 : vector<1x32xf32> to vector<16x32xf32>
    %263 = arith.mulf %261, %262 : vector<16x32xf32>
    %264 = vector.broadcast %175 : vector<1x32xf32> to vector<16x32xf32>
    %265 = arith.addf %263, %264 : vector<16x32xf32>
    %c1_78 = arith.constant 1 : index
    %c0_79 = arith.constant 0 : index
    %c0_80 = arith.constant 0 : index
    %266 = vector.load %arg6[%c1_78, %c0_79, %c0_80] : memref<2x32x64xbf16, #tpu.memory_space<vmem>>, vector<1x32x64xbf16>
    %267 = vector.shape_cast %266 : vector<1x32x64xbf16> to vector<32x64xbf16>
    %268 = arith.truncf %265 : vector<16x32xf32> to vector<16x32xbf16>
    %cst_81 = arith.constant dense<0.000000e+00> : vector<16x64xf32>
    %269 = tpu.matmul %268, %267, %cst_81 {dimension_numbers = #tpu.dot_dimension_numbers<[1], [0], [0], [1], [0, 0, 1, 1], [], []>} : vector<16x32xbf16>, vector<32x64xbf16>, vector<16x64xf32> -> vector<16x64xf32>
    %270 = vector.broadcast %176 : vector<1x64xf32> to vector<16x64xf32>
    %271 = arith.addf %269, %270 : vector<16x64xf32>
    %272 = arith.mulf %271, %271 : vector<16x64xf32>
    %273 = arith.mulf %271, %272 : vector<16x64xf32>
    %cst_82 = arith.constant 4.471500e-02 : f32
    %274 = vector.broadcast %cst_82 : f32 to vector<16x64xf32>
    %275 = arith.mulf %274, %273 : vector<16x64xf32>
    %276 = arith.addf %271, %275 : vector<16x64xf32>
    %cst_83 = arith.constant 0.797884583 : f32
    %277 = vector.broadcast %cst_83 : f32 to vector<16x64xf32>
    %278 = arith.mulf %277, %276 : vector<16x64xf32>
    %279 = math.tanh %278 : vector<16x64xf32>
    %cst_84 = arith.constant 1.000000e+00 : f32
    %280 = vector.broadcast %cst_84 : f32 to vector<16x64xf32>
    %281 = arith.addf %280, %279 : vector<16x64xf32>
    %cst_85 = arith.constant 5.000000e-01 : f32
    %282 = vector.broadcast %cst_85 : f32 to vector<16x64xf32>
    %283 = arith.mulf %282, %281 : vector<16x64xf32>
    %284 = arith.mulf %271, %283 : vector<16x64xf32>
    %c1_86 = arith.constant 1 : index
    %c0_87 = arith.constant 0 : index
    %c0_88 = arith.constant 0 : index
    %285 = vector.load %arg7[%c1_86, %c0_87, %c0_88] : memref<2x64x32xbf16, #tpu.memory_space<vmem>>, vector<1x64x32xbf16>
    %286 = vector.shape_cast %285 : vector<1x64x32xbf16> to vector<64x32xbf16>
    %287 = arith.truncf %284 : vector<16x64xf32> to vector<16x64xbf16>
    %cst_89 = arith.constant dense<0.000000e+00> : vector<16x32xf32>
    %288 = tpu.matmul %287, %286, %cst_89 {dimension_numbers = #tpu.dot_dimension_numbers<[1], [0], [0], [1], [0, 0, 1, 1], [], []>} : vector<16x64xbf16>, vector<64x32xbf16>, vector<16x32xf32> -> vector<16x32xf32>
    %289 = vector.broadcast %177 : vector<1x32xf32> to vector<16x32xf32>
    %290 = arith.addf %288, %289 : vector<16x32xf32>
    %291 = arith.addf %290, %265 : vector<16x32xf32>
    %cst_90 = arith.constant dense<0.000000e+00> : vector<16xf32>
    %292 = vector.multi_reduction <add>, %291, %cst_90 [1] : vector<16x32xf32> to vector<16xf32>
    %293 = vector.shape_cast %292 : vector<16xf32> to vector<16x1xf32>
    %cst_91 = arith.constant 3.200000e+01 : f32
    %294 = vector.broadcast %cst_91 : f32 to vector<16x1xf32>
    %295 = arith.divf %293, %294 : vector<16x1xf32>
    %296 = vector.broadcast %295 : vector<16x1xf32> to vector<16x32xf32>
    %297 = arith.subf %291, %296 : vector<16x32xf32>
    %298 = arith.mulf %297, %297 : vector<16x32xf32>
    %cst_92 = arith.constant dense<0.000000e+00> : vector<16xf32>
    %299 = vector.multi_reduction <add>, %298, %cst_92 [1] : vector<16x32xf32> to vector<16xf32>
    %300 = vector.shape_cast %299 : vector<16xf32> to vector<16x1xf32>
    %cst_93 = arith.constant 3.200000e+01 : f32
    %301 = vector.broadcast %cst_93 : f32 to vector<16x1xf32>
    %302 = arith.divf %300, %301 : vector<16x1xf32>
    %cst_94 = arith.constant 9.99999996E-13 : f32
    %303 = vector.broadcast %cst_94 : f32 to vector<16x1xf32>
    %304 = arith.addf %302, %303 : vector<16x1xf32>
    %305 = math.rsqrt %304 : vector<16x1xf32>
    %306 = vector.broadcast %305 : vector<16x1xf32> to vector<16x32xf32>
    %307 = arith.mulf %297, %306 : vector<16x32xf32>
    %308 = vector.broadcast %178 : vector<1x32xf32> to vector<16x32xf32>
    %309 = arith.mulf %307, %308 : vector<16x32xf32>
    %310 = vector.broadcast %179 : vector<1x32xf32> to vector<16x32xf32>
    %311 = arith.addf %309, %310 : vector<16x32xf32>
    %312 = vector.shape_cast %311 : vector<16x32xf32> to vector<2x8x32xf32>
    %313 = vector.extract_strided_slice %312 {offsets = [0, 0, 0], sizes = [2, 1, 32], strides = [1, 1, 1]} : vector<2x8x32xf32> to vector<2x1x32xf32>
    %314 = vector.shape_cast %313 : vector<2x1x32xf32> to vector<2x32xf32>
    %c0_95 = arith.constant 0 : index
    %c0_96 = arith.constant 0 : index
    %315 = vector.load %arg9[%c0_95, %c0_96] : memref<32x32xbf16, #tpu.memory_space<vmem>>, vector<32x32xbf16>
    %316 = arith.truncf %314 : vector<2x32xf32> to vector<2x32xbf16>
    %cst_97 = arith.constant dense<0.000000e+00> : vector<2x32xf32>
    %317 = tpu.matmul %316, %315, %cst_97 {dimension_numbers = #tpu.dot_dimension_numbers<[1], [0], [0], [1], [0, 0, 1, 1], [], []>} : vector<2x32xbf16>, vector<32x32xbf16>, vector<2x32xf32> -> vector<2x32xf32>
    %318 = vector.broadcast %3 : vector<1x32xf32> to vector<2x32xf32>
    %319 = arith.addf %317, %318 : vector<2x32xf32>
    %320 = math.tanh %319 : vector<2x32xf32>
    %c0_98 = arith.constant 0 : index
    %c0_99 = arith.constant 0 : index
    %321 = vector.load %arg10[%c0_98, %c0_99] : memref<32x32xbf16, #tpu.memory_space<vmem>>, vector<32x32xbf16>
    %322 = arith.truncf %320 : vector<2x32xf32> to vector<2x32xbf16>
    %cst_100 = arith.constant dense<0.000000e+00> : vector<2x32xf32>
    %323 = tpu.matmul %322, %321, %cst_100 {dimension_numbers = #tpu.dot_dimension_numbers<[1], [0], [0], [1], [0, 0, 1, 1], [], []>} : vector<2x32xbf16>, vector<32x32xbf16>, vector<2x32xf32> -> vector<2x32xf32>
    %324 = vector.broadcast %4 : vector<1x32xf32> to vector<2x32xf32>
    %325 = arith.addf %323, %324 : vector<2x32xf32>
    %326 = math.tanh %325 : vector<2x32xf32>
    %c0_101 = arith.constant 0 : index
    %c0_102 = arith.constant 0 : index
    %327 = vector.load %arg11[%c0_101, %c0_102] : memref<32x128xbf16, #tpu.memory_space<vmem>>, vector<32x128xbf16>
    %328 = arith.truncf %326 : vector<2x32xf32> to vector<2x32xbf16>
    %cst_103 = arith.constant dense<0.000000e+00> : vector<2x128xf32>
    %329 = tpu.matmul %328, %327, %cst_103 {dimension_numbers = #tpu.dot_dimension_numbers<[1], [0], [0], [1], [0, 0, 1, 1], [], []>} : vector<2x32xbf16>, vector<32x128xbf16>, vector<2x128xf32> -> vector<2x128xf32>
    %330 = vector.broadcast %5 : vector<1x128xf32> to vector<2x128xf32>
    %331 = arith.addf %329, %330 : vector<2x128xf32>
    %c0_104 = arith.constant 0 : index
    %c0_105 = arith.constant 0 : index
    %332 = vector.load %arg12[%c0_104, %c0_105] : memref<2x128xf32, #tpu.memory_space<vmem>>, vector<2x128xf32>
    tpu.vector_store %arg12[%c0_104, %c0_105], %331 {strides = array<i32>} : memref<2x128xf32, #tpu.memory_space<vmem>>, vector<2x128xf32>,
    return
  }
  func.func @transform_0(%arg0: i32) -> (i32, i32) {
    %c0_i32 = arith.constant 0 : i32
    %c0_i32_0 = arith.constant 0 : i32
    %c0_i32_1 = arith.constant 0 : i32
    return %c0_i32, %c0_i32_0 : i32, i32
  }
  func.func @transform_1(%arg0: i32) -> (i32, i32, i32) {
    %c0_i32 = arith.constant 0 : i32
    %c0_i32_0 = arith.constant 0 : i32
    %c0_i32_1 = arith.constant 0 : i32
    %c0_i32_2 = arith.constant 0 : i32
    return %c0_i32, %c0_i32_0, %c0_i32_1 : i32, i32, i32
  }
  func.func @transform_2(%arg0: i32) -> (i32, i32) {
    %c0_i32 = arith.constant 0 : i32
    %c0_i32_0 = arith.constant 0 : i32
    %c0_i32_1 = arith.constant 0 : i32
    return %c0_i32, %c0_i32_0 : i32, i32
  }
  func.func @transform_3(%arg0: i32) -> (i32, i32, i32) {
    %c0_i32 = arith.constant 0 : i32
    %c0_i32_0 = arith.constant 0 : i32
    %c0_i32_1 = arith.constant 0 : i32
    %c0_i32_2 = arith.constant 0 : i32
    return %c0_i32, %c0_i32_0, %c0_i32_1 : i32, i32, i32
  }
  func.func @transform_4(%arg0: i32) -> (i32, i32, i32) {
    %c0_i32 = arith.constant 0 : i32
    %c0_i32_0 = arith.constant 0 : i32
    %c0_i32_1 = arith.constant 0 : i32
    %c0_i32_2 = arith.constant 0 : i32
    return %c0_i32, %c0_i32_0, %c0_i32_1 : i32, i32, i32
  }
  func.func @transform_5(%arg0: i32) -> (i32, i32, i32) {
    %c0_i32 = arith.constant 0 : i32
    %c0_i32_0 = arith.constant 0 : i32
    %c0_i32_1 = arith.constant 0 : i32
    %c0_i32_2 = arith.constant 0 : i32
    return %c0_i32, %c0_i32_0, %c0_i32_1 : i32, i32, i32
  }
  func.func @transform_6(%arg0: i32) -> (i32, i32, i32) {
    %c0_i32 = arith.constant 0 : i32
    %c0_i32_0 = arith.constant 0 : i32
    %c0_i32_1 = arith.constant 0 : i32
    %c0_i32_2 = arith.constant 0 : i32
    return %c0_i32, %c0_i32_0, %c0_i32_1 : i32, i32, i32
  }
  func.func @transform_7(%arg0: i32) -> (i32, i32, i32) {
    %c0_i32 = arith.constant 0 : i32
    %c0_i32_0 = arith.constant 0 : i32
    %c0_i32_1 = arith.constant 0 : i32
    %c0_i32_2 = arith.constant 0 : i32
    return %c0_i32, %c0_i32_0, %c0_i32_1 : i32, i32, i32
  }
  func.func @transform_8(%arg0: i32) -> (i32, i32) {
    %c0_i32 = arith.constant 0 : i32
    %c0_i32_0 = arith.constant 0 : i32
    %c0_i32_1 = arith.constant 0 : i32
    return %c0_i32, %c0_i32_0 : i32, i32
  }
  func.func @transform_9(%arg0: i32) -> (i32, i32) {
    %c0_i32 = arith.constant 0 : i32
    %c0_i32_0 = arith.constant 0 : i32
    %c0_i32_1 = arith.constant 0 : i32
    return %c0_i32, %c0_i32_0 : i32, i32
  }
  func.func @transform_10(%arg0: i32) -> (i32, i32) {
    %c0_i32 = arith.constant 0 : i32
    %c0_i32_0 = arith.constant 0 : i32
    %c0_i32_1 = arith.constant 0 : i32
    return %c0_i32, %c0_i32_0 : i32, i32
  }
  func.func @transform_11(%arg0: i32) -> (i32, i32) {
    %c0_i32 = arith.constant 0 : i32
    %c0_i32_0 = arith.constant 0 : i32
    %c0_i32_1 = arith.constant 0 : i32
    return %c0_i32, %c0_i32_0 : i32, i32
  }
}

</mosaic_0001>

<bundles_post_ra>
// kernel: tpu_custom_call.1
= control target key start
LH: loop header
LB: loop body
LE: loop exit
PB: predicated region body
PF: predicated region fallthrough
CT: control target
= control target key end

     0   :  { %16 = vsyncpa [#allocation3], 0  ;;  %s3174_s0 = inlined_call_operand.hbm [shape: f32[16,32], index: 0, kind: input, shape index: {}]   ;;  %s3175_s1 = inlined_call_operand.hbm [shape: f32[2,8,8], index: 1, kind: input, shape index: {}]   ;;  %s3176_s2 = inlined_call_operand.hbm [shape: f32[8,128], index: 2, kind: input, shape index: {}]   ;;  %s3177_s3 = inlined_call_operand.vmem [shape: bf16[2,32,96], index: 3, kind: input, shape index: {}]   ;;  %s3178_s4 = inlined_call_operand.vmem [shape: bf16[2,32,32], index: 4, kind: input, shape index: {}]   ;;  %s3179_s5 = inlined_call_operand.vmem [shape: bf16[2,32,64], index: 5, kind: input, shape index: {}]   ;;  %s3180_s6 = inlined_call_operand.vmem [shape: bf16[2,64,32], index: 6, kind: input, shape index: {}]   ;;  %s3181_s7 = inlined_call_operand.hbm [shape: f32[2,8,128], index: 7, kind: input, shape index: {}]   ;;  %s3182_s8 = inlined_call_operand.hbm [shape: bf16[32,32], index: 8, kind: input, shape index: {}]   ;;  %s3183_s9 = inlined_call_operand.vmem [shape: bf16[32,32], index: 9, kind: input, shape index: {}]   ;;  %s3184_s10 = inlined_call_operand.hbm [shape: bf16[32,128], index: 10, kind: input, shape index: {}]   ;;  %s3185_s11 = inlined_call_operand.hbm [shape: f32[2,128], index: 11, kind: output, shape index: {}]  }
   0x1   :  { %17 = vsyncpa [#allocation6], 0 }
   0x2   :  { %18 = vsyncpa [#allocation9], 0 }
   0x3   :  { %19 = vsyncpa [#allocation12], 0 }
   0x4   :  { %20 = vsyncpa [#allocation4], 0  ;;  %s2665_s17 = smov [#allocation5]   ;;  %s2666_s19 = smov [#allocation8]  }
   0x5   :  { %s38_s18 = sshll.u32 %s2665_s17, 4  ;;  %s68_s20 = sshll.u32 %s2666_s19, 4  ;;  %s39_s18 = int_to_ptr.vmem [resolvable:$true] %s38_s18  ;;  %s69_s20 = int_to_ptr.vmem [resolvable:$true] %s68_s20 }
   0x6   :  { %s2523_s21 = scalar_lea.vmem %s39_s18, 256  ;;  %p2528_p1 = scmp.lt.s32.totalorder %s39_s18, %s39_s18 }
   0x7   :  { %p2524_p0 = scmp.ne.s32.totalorder %s39_s18, %s2523_s21  ;;  %p2529_p2 = scmp.lt.s32.totalorder %s2523_s21, %s2523_s21 }
   0x9   :  { %p2530_p3 = por %p2529_p2, %p2528_p1 }
   0xb   :  { %p2531_p4 = pnand %p2530_p3, %p2524_p0 }
   0xd   :  { %2534 = shalt.err (!%p2531_p4)
}
   0xe   :  { %s2667_s22 = smov 128   ;;  %s2668_s23 = smov 8  }
   0xf   :  { %44 = dma.hbm_to_vmem [thread:$0]  %s3175_s1, 256, %s39_s18, [#allocation6], %s2667_s22, %s2667_s22, %s2668_s23  }
  0x10   :  { %s2543_s26 = scalar_lea.vmem %s69_s20, 256  ;;  %p2548_p6 = scmp.lt.s32.totalorder %s69_s20, %s69_s20 }
  0x11   :  { %p2544_p5 = scmp.ne.s32.totalorder %s69_s20, %s2543_s26  ;;  %p2549_p7 = scmp.lt.s32.totalorder %s2543_s26, %s2543_s26 }
  0x13   :  { %p2550_p8 = por %p2549_p7, %p2548_p6 }
  0x15   :  { %p2551_p9 = pnand %p2550_p8, %p2544_p5 }
  0x17   :  { %2554 = shalt.err (!%p2551_p9)
}
  0x18   :  { %74 = dma.hbm_to_vmem [thread:$0]  %s3181_s7, 256, %s69_s20, [#allocation9], %s2667_s22, %s2667_s22, %s2668_s23  }
  0x19   :  { %s2669_s29 = smov [#allocation2]   ;;  %s2670_s12 = smov [#allocation7]  }
  0x1a   :  { %s26_s30 = sshll.u32 %s2669_s29, 4  ;;  %s51_s13 = sshll.u32 %s2670_s12, 4  ;;  %s27_s30 = int_to_ptr.vmem [resolvable:$true] %s26_s30  ;;  %s52_s13 = int_to_ptr.vmem [resolvable:$true] %s51_s13 }
  0x1b   :  { %s2563_s14 = scalar_lea.vmem %s27_s30, 256  ;;  %p2568_p11 = scmp.lt.s32.totalorder %s27_s30, %s27_s30 }
  0x1c   :  { %p2564_p10 = scmp.ne.s32.totalorder %s27_s30, %s2563_s14  ;;  %p2569_p12 = scmp.lt.s32.totalorder %s2563_s14, %s2563_s14 }
  0x1e   :  { %p2570_p13 = por %p2569_p12, %p2568_p11 }
  0x20   :  { %p2571_p0 = pnand %p2570_p13, %p2564_p10 }
  0x22   :  { %2574 = shalt.err (!%p2571_p0)
}
  0x23   :  { %32 = dma.hbm_to_vmem [thread:$0]  %s3174_s0, 256, %s27_s30, [#allocation3], %s2667_s22, %s2667_s22, %s2668_s23  }
  0x24   :  { %s2583_s16 = scalar_lea.vmem %s52_s13, 128  ;;  %p2588_p2 = scmp.lt.s32.totalorder %s52_s13, %s52_s13 }
  0x25   :  { %p2584_p1 = scmp.ne.s32.totalorder %s52_s13, %s2583_s16  ;;  %p2589_p3 = scmp.lt.s32.totalorder %s2583_s16, %s2583_s16 }
  0x27   :  { %p2590_p4 = por %p2589_p3, %p2588_p2 }
  0x29   :  { %p2591_p5 = pnand %p2590_p4, %p2584_p1 }
  0x2b   :  { %2594 = shalt.err (!%p2591_p5)
}
  0x2c   :  { %54 = dma.hbm_to_vmem [thread:$0]  %s3176_s2, 128, %s52_s13, [#allocation6]  }
  0x2d   :  { %s2671_s18 = smov [#allocation10]  }
  0x2e   :  { %s80_s19 = sshll.u32 %s2671_s18, 4  ;;  %s81_s19 = int_to_ptr.vmem [resolvable:$true] %s80_s19 }
  0x2f   :  { %s2603_s20 = scalar_lea.vmem %s81_s19, 256  ;;  %p2608_p7 = scmp.lt.s32.totalorder %s81_s19, %s81_s19 }
  0x30   :  { %p2604_p6 = scmp.ne.s32.totalorder %s81_s19, %s2603_s20  ;;  %p2609_p8 = scmp.lt.s32.totalorder %s2603_s20, %s2603_s20 }
  0x32   :  { %p2610_p9 = por %p2609_p8, %p2608_p7 }
  0x34   :  { %p2611_p10 = pnand %p2610_p9, %p2604_p6 }
  0x36   :  { %2614 = shalt.err (!%p2611_p10)
}
  0x37   :  { %s2672_s0 = smov 64   ;;  %s2673_s21 = smov 4  }
  0x38   :  { %86 = dma.hbm_to_vmem [thread:$0]  %s3182_s8, 256, %s81_s19, [#allocation9], %s2672_s0, %s2672_s0, %s2673_s21  }
  0x39   :  { %s2674_s24 = smov [#allocation11]  }
  0x3a   :  { %s94_s2 = sshll.u32 %s2674_s24, 4  ;;  %s95_s2 = int_to_ptr.vmem [resolvable:$true] %s94_s2 }
  0x3b   :  { %s2623_s25 = scalar_lea.vmem %s95_s2, 256  ;;  %p2628_p12 = scmp.lt.s32.totalorder %s95_s2, %s95_s2 }
  0x3c   :  { %p2624_p11 = scmp.ne.s32.totalorder %s95_s2, %s2623_s25  ;;  %p2629_p13 = scmp.lt.s32.totalorder %s2623_s25, %s2623_s25 }
  0x3e   :  { %p2630_p0 = por %p2629_p13, %p2628_p12 }
  0x40   :  { %p2631_p1 = pnand %p2630_p0, %p2624_p11 }
  0x42   :  { %2634 = shalt.err (!%p2631_p1)
}
  0x43   :  { %100 = dma.hbm_to_vmem [thread:$0]  %s3184_s10, 256, %s95_s2, [#allocation12], %s2672_s0, %s2672_s0, %s2673_s21  }
  0x44   :  { %2655 = dma.done.wait [#allocation3], 256  }
  0x45   :  { %2656 = vsyncadd [#allocation3], 4294967040 }
  0x46   :  { %2657 = dma.done.wait [#allocation6], 384  }
  0x47   :  { %2658 = vsyncadd [#allocation6], 4294966912 }
  0x48   :  { %2659 = dma.done.wait [#allocation9], 512  }
  0x49   :  { %2660 = vsyncadd [#allocation9], 4294966784 }
  0x4a   :  { %2661 = dma.done.wait [#allocation12], 256  }
  0x4b   :  { %2662 = vsyncadd [#allocation12], 4294967040  ;;  %vm125_vm0 = vcmask 261120   ;;  %v123_v0 = vld [vmem:[#allocation2] sm:$0xff]  ;;  %v124_v1 = vld [vmem:[#allocation2 + $0x8] sm:$0xff]  ;;  %v2675_v15 = vmov 0.0   ;;  %v153_v23 = vlaneseq }
  0x4c   :  { %v126_v2 = vsel %vm125_vm0, %v123_v0, 0.0  ;;  %v129_v3 = vsel %vm125_vm0, %v124_v1, 0.0  ;;  %v2424_v14 = vld [vmem:[%s3177_s3 + $0x8] sm:$0xff]   ;;  %2204 = vmatprep.subr.bf16.mxu0 %v2675_v15  ;;  %vm2676_vm1 = vmmov 0   ;;  %v2425_v16 = vld [vmem:[%s3177_s3] sm:$0xff]   ;;  %2212 = vmatprep.subr.bf16.mxu1 %v2675_v15  ;;  %s2677_s30 = smov 96  }
  0x4d   :  { %127 = vadd.xlane.f32.xlu0 %v126_v2  ;;  %2208 = vmatprep.mubr.msk.bf16.mxu0 %vm2676_vm1, %v2675_v15  ;;  %v2783_v24 = vshrl.u32 %v153_v23, 7  ;;  %v120_v26 = vld [vmem:[#allocation7] sm:$0xff]  ;;  %v2802_v39 = vld [vmem:[#allocation8] sm:$0xff]  ;;  %vm236_vm2 = vcmask 130048   ;;  %v2826_v54 = vld [vmem:[#allocation5] sm:$0xff]  ;;  %vm336_vm3 = vcmask 64512  }
  0x4e   :  { %2205 = vmatpush3.bf16.msra.mxu0 %v2424_v14  ;;  %2214 = vmatprep.mubr.msk.bf16.mxu1 %vm2676_vm1, %v2675_v15  ;;  %v2829_v60 = vld [vmem:[#allocation5 + $0x8] sm:$0xff]  ;;  %s2678_s12 = smov 80   ;;  %vm366_vm4 = vcmask 1043456   ;;  %s2679_s13 = smov 112   ;;  %vm917_vm5 = vcmask 523264   ;;  %vm1855_vm6 = vcmask 1041409  }
  0x4f   :  { %2206 = vmatprep.subr.bf16.mxu0 %v2675_v15  ;;  %v2786_v25 = vsub.s32 0, %v2783_v24  ;;  %v2790_v30 = vsub.s32 1, %v2783_v24  ;;  %s2680_s14 = smov 48   ;;  %s2681_s17 = smov 16  }
  0x51   :  { %130 = vadd.xlane.f32.xlu0 %v129_v3  ;;  %v156_v29 = vrot.slane %v120_v26, %v2786_v25  ;;  %v162_v34 = vrot.slane %v120_v26, %v2790_v30  ;;  %v174_v40 = vrot.slane %v2802_v39, %v2786_v25 }
  0x52   :  { %2207 = vmatpush3.bf16.msra.mxu0 %v2425_v16 }
  0x53   :  { %2218 = vmatprep.subr.bf16.mxu0 %v2675_v15 }
  0xd6   :  { %v128_v4 = vpop.xlane.xlu0 %127 }
  0xd7   :  { %v133_v5 = vmul.f32 0.03125, %v128_v4 }
  0xd9   :  { %v135_v6 = vsub.f32 %v123_v0, %v133_v5 }
  0xda   :  { %v131_v7 = vpop.xlane.xlu0 %130 }
  0xdb   :  { %v134_v8 = vmul.f32 0.03125, %v131_v7  ;;  %v137_v9 = vmul.f32 %v135_v6, %v135_v6 }
  0xdd   :  { %v136_v10 = vsub.f32 %v124_v1, %v134_v8  ;;  %v139_v11 = vsel %vm125_vm0, %v137_v9, 0.0 }
  0xde   :  { %140 = vadd.xlane.f32.xlu1 %v139_v11 }
  0xdf   :  { %v138_v12 = vmul.f32 %v136_v10, %v136_v10 }
  0xe1   :  { %v142_v13 = vsel %vm125_vm0, %v138_v12, 0.0 }
  0xe2   :  { %143 = vadd.xlane.f32.xlu1 %v142_v13 }
 0x167   :  { %v141_v17 = vpop.xlane.xlu1 %140 }
 0x168   :  { %v145_v18 = vmul.f32 0.03125, %v141_v17 }
 0x16a   :  { %v147_v19 = vadd.f32 1e-12, %v145_v18 }
 0x16b   :  { %v144_v20 = vpop.xlane.xlu1 %143 }
 0x16c   :  { %2450 = vrsqrt.f32 %v147_v19  ;;  %v146_v21 = vmul.f32 0.03125, %v144_v20 }
 0x16e   :  { %v148_v22 = vadd.f32 1e-12, %v146_v21 }
 0x170   :  { %2452 = vrsqrt.f32 %v148_v22 }
 0x179   :  { %v2451_v27 = vpop.eup %2450 }
 0x17a   :  { %v151_v28 = vmul.f32 %v2451_v27, %v135_v6 }
 0x17c   :  { %v157_v33 = vmul.f32 %v156_v29, %v151_v28 }
 0x17d   :  { %v2453_v31 = vpop.eup %2452 }
 0x17e   :  { %v152_v32 = vmul.f32 %v2453_v31, %v136_v10  ;;  %v2793_v36 = vadd.f32 %v162_v34, %v157_v33 }
 0x180   :  { %v158_v35 = vmul.f32 %v156_v29, %v152_v32 }
 0x182   :  { %v2795_v37 = vadd.f32 %v162_v34, %v158_v35 }
 0x184   :  { %v170_v38 = vpack.c.bf16 %v2795_v37, %v2793_v36 }
 0x186   :  { %2209 = vmatmul.mubr.msk.bf16.vlgmr.msra.gmra.mxu0 %vm125_vm0, %v170_v38 }
 0x187   :  { %2220 = vmatprep.mubr.msk.bf16.mxu0 %vm2676_vm1, %v2675_v15 }
 0x246   :  { %v224_v41 = vpop.f32.mrf.mxu0 }
 0x247   :  { %v225_v42 = vadd.f32 %v224_v41, %v174_v40 }
 0x248   :  { %v2210_v43 = vpop.f32.mrf.mxu0 }
 0x249   :  { %v2806_v44 = vpack.c.bf16 %v225_v42, %v225_v42 }
 0x24a   :  { %v227_v45 = vpop.f32.mrf.mxu0 }
 0x24b   :  { %v228_v46 = vadd.f32 %v227_v45, %v174_v40  ;;  %234 = vrot.lane.b32.xlu0 %v2806_v44, %s2677_s30 }
 0x24c   :  { %v2211_v47 = vpop.f32.mrf.mxu0 }
 0x24d   :  { %v2810_v48 = vpack.c.bf16 %v228_v46, %v228_v46 }
 0x24f   :  { %284 = vrot.lane.b32.xlu1 %v2810_v48, %s2677_s30 }
 0x2bd   :  { %v235_v49 = vpop.permute.xlu0 %234 }
 0x2be   :  { %v241_v50 = vsel %vm236_vm2, %v235_v49, 0 }
 0x2bf   :  { %2213 = vmatpush3.bf16.xpose.msra.mxu1 %v241_v50 }
 0x2c0   :  { %2224 = vmatprep.subr.bf16.mxu1 %v2675_v15 }
 0x2c1   :  { %v285_v51 = vpop.permute.xlu1 %284 }
 0x2c2   :  { %v290_v52 = vsel %vm236_vm2, %v285_v51, 0 }
 0x2c3   :  { %2219 = vmatpush3.bf16.xpose.msra.mxu0 %v290_v52 }
 0x2c4   :  { %2230 = vmatprep.subr.bf16.mxu0 %v2675_v15 }
 0x2c6   :  { %2215 = vmatmul.mubr.msk.bf16.vlgmr.msra.gmra.mxu1 %vm236_vm2, %v2806_v44 }
 0x2c7   :  { %2226 = vmatprep.mubr.msk.bf16.mxu1 %vm2676_vm1, %v2675_v15 }
 0x2ca   :  { %2221 = vmatmul.mubr.msk.bf16.vlgmr.msra.gmra.mxu0 %vm236_vm2, %v2810_v48 }
 0x2cb   :  { %2232 = vmatprep.mubr.msk.bf16.mxu0 %vm2676_vm1, %v2675_v15 }
 0x386   :  { %v277_v53 = vpop.f32.mrf.mxu1 }
 0x387   :  { %v332_v55 = vmul.f32 0.25, %v277_v53 }
 0x388   :  { %v2216_v56 = vpop.f32.mrf.mxu1 }
 0x389   :  { %v334_v57 = vadd.f32 %v332_v55, %v2826_v54 }
 0x38a   :  { %v280_v58 = vpop.f32.mrf.mxu1  ;;  %v326_v59 = vpop.f32.mrf.mxu0 }
 0x38b   :  { %v333_v61 = vmul.f32 0.25, %v326_v59  ;;  %v337_v62 = vsel %vm336_vm3, %v334_v57, -inf }
 0x38c   :  { %v2217_v63 = vpop.f32.mrf.mxu1  ;;  %338 = vmax.xlane.f32.xlu1 %v337_v62  ;;  %v2222_v0 = vpop.f32.mrf.mxu0 }
 0x38d   :  { %v335_v1 = vadd.f32 %v333_v61, %v2829_v60 }
 0x38e   :  { %v329_v2 = vpop.f32.mrf.mxu0 }
 0x38f   :  { %v340_v3 = vsel %vm336_vm3, %v335_v1, -inf }
 0x390   :  { %341 = vmax.xlane.f32.xlu0 %v340_v3  ;;  %v2223_v4 = vpop.f32.mrf.mxu0 }
 0x39d   :  { %410 = vrot.lane.b32.xlu1 %v2810_v48, %s2672_s0 }
 0x3a1   :  { %460 = vrot.lane.b32.xlu1 %v2806_v44, %s2678_s12 }
 0x415   :  { %v339_v5 = vpop.xlane.xlu1 %338 }
 0x416   :  { %v343_v6 = vsub.f32 %v334_v57, %v339_v5 }
 0x418   :  { %v345_v7 = vmul.f32 1.442695, %v343_v6 }
 0x419   :  { %v411_v8 = vpop.permute.xlu1 %410  ;;  %v342_v9 = vpop.xlane.xlu0 %341 }
 0x41a   :  { %2454 = vpow2.f32 %v345_v7  ;;  %v416_v10 = vsel %vm366_vm4, %v411_v8, 0  ;;  %v344_v11 = vsub.f32 %v335_v1, %v342_v9 }
 0x41b   :  { %2231 = vmatpush3.bf16.msra.mxu0 %v416_v10 }
 0x41c   :  { %v347_v12 = vmul.f32 1.442695, %v344_v11  ;;  %2242 = vmatprep.subr.bf16.mxu0 %v2675_v15 }
 0x41d   :  { %v461_v18 = vpop.permute.xlu1 %460 }
 0x41e   :  { %2456 = vpow2.f32 %v347_v12  ;;  %v466_v29 = vsel %vm236_vm2, %v461_v18, 0 }
 0x427   :  { %v2455_v13 = vpop.eup %2454 }
 0x428   :  { %v349_v14 = vsel %vm336_vm3, %v2455_v13, 0.0 }
 0x429   :  { %350 = vadd.xlane.f32.xlu0 %v349_v14 }
 0x42b   :  { %v2457_v16 = vpop.eup %2456 }
 0x42c   :  { %v352_v17 = vsel %vm336_vm3, %v2457_v16, 0.0 }
 0x42d   :  { %353 = vadd.xlane.f32.xlu1 %v352_v17 }
 0x43e   :  { %510 = vrot.lane.b32.xlu1 %v2810_v48, %s2678_s12 }
 0x43f   :  { %361 = vrot.lane.b32.xlu0 %v2806_v44, %s2672_s0 }
 0x442   :  { %508 = vrot.lane.b32.xlu1 %v2810_v48, %s2679_s13 }
 0x443   :  { %458 = vrot.lane.b32.xlu0 %v2806_v44, %s2679_s13 }
 0x4b2   :  { %v351_v19 = vpop.xlane.xlu0 %350 }
 0x4b3   :  { %2458 = vrcp.f32 %v351_v19 }
 0x4b6   :  { %v354_v20 = vpop.xlane.xlu1 %353  ;;  %v362_v21 = vpop.permute.xlu0 %361 }
 0x4b7   :  { %2460 = vrcp.f32 %v354_v20  ;;  %v368_v22 = vsel %vm366_vm4, %v362_v21, 0 }
 0x4b8   :  { %2225 = vmatpush3.bf16.msra.mxu1 %v368_v22 }
 0x4b9   :  { %2236 = vmatprep.subr.bf16.mxu1 %v2675_v15 }
 0x4ba   :  { %v511_v32 = vpop.permute.xlu1 %510  ;;  %v459_v35 = vpop.permute.xlu0 %458 }
 0x4bb   :  { %v516_v34 = vsel %vm236_vm2, %v511_v32, 0 }
 0x4be   :  { %v509_v38 = vpop.permute.xlu1 %508 }
 0x4c0   :  { %v2459_v23 = vpop.eup %2458 }
 0x4c1   :  { %v357_v26 = vmul.f32 %v2459_v23, %v2455_v13  ;;  %v2426_v23 = vld [vmem:[%s3178_s4 + $0x8] sm:$0xff]  }
 0x4c3   :  { %v359_v27 = vpack.c.bf16 %v357_v26, %v357_v26  ;;  %v2427_v26 = vld [vmem:[%s3178_s4] sm:$0xff]  }
 0x4c4   :  { %v2461_v28 = vpop.eup %2460 }
 0x4c5   :  { %2227 = vmatmul.mubr.msk.bf16.vlgmr.msra.gmra.mxu1 %vm336_vm3, %v359_v27  ;;  %v358_v31 = vmul.f32 %v2461_v28, %v2457_v16 }
 0x4c6   :  { %2237 = vmatpush3.bf16.xpose.msra.mxu1 %v466_v29  ;;  %2238 = vmatprep.mubr.msk.bf16.mxu1 %vm2676_vm1, %v2675_v15 }
 0x4c7   :  { %v360_v33 = vpack.c.bf16 %v358_v31, %v358_v31  ;;  %2248 = vmatprep.subr.bf16.mxu1 %v2675_v15 }
 0x4c9   :  { %2233 = vmatmul.mubr.msk.bf16.vlgmr.msra.gmra.mxu0 %vm336_vm3, %v360_v33 }
 0x4ca   :  { %2243 = vmatpush3.bf16.xpose.msra.mxu0 %v516_v34  ;;  %2244 = vmatprep.mubr.msk.bf16.mxu0 %vm2676_vm1, %v2675_v15 }
 0x4cb   :  { %2254 = vmatprep.subr.bf16.mxu0 %v2675_v15 }
 0x4cd   :  { %2239 = vmatmul.mubr.msk.bf16.vlgmr.msra.gmra.mxu1 %vm236_vm2, %v459_v35 }
 0x4ce   :  { %2250 = vmatprep.mubr.msk.bf16.mxu1 %vm2676_vm1, %v2675_v15 }
 0x4d1   :  { %2245 = vmatmul.mubr.msk.bf16.vlgmr.msra.gmra.mxu0 %vm236_vm2, %v509_v38 }
 0x4d2   :  { %2256 = vmatprep.mubr.msk.bf16.mxu0 %vm2676_vm1, %v2675_v15 }
 0x585   :  { %v2868_v40 = vpop.f32.mrf.mxu1 }
 0x587   :  { %v2228_v41 = vpop.f32.mrf.mxu1 }
 0x589   :  { %v407_v42 = vpop.f32.mrf.mxu1  ;;  %v2870_v43 = vpop.f32.mrf.mxu0 }
 0x58b   :  { %v2229_v45 = vpop.f32.mrf.mxu1  ;;  %v2234_v46 = vpop.f32.mrf.mxu0 }
 0x58d   :  { %v455_v47 = vpop.f32.mrf.mxu0  ;;  %v502_v49 = vpop.f32.mrf.mxu1 }
 0x58e   :  { %v558_v50 = vmul.f32 0.25, %v502_v49 }
 0x58f   :  { %v2235_v51 = vpop.f32.mrf.mxu0  ;;  %v2240_v52 = vpop.f32.mrf.mxu1 }
 0x590   :  { %v560_v53 = vadd.f32 %v558_v50, %v2826_v54  ;;  %v700_v50 = vrot.slane %v2802_v39, %v2790_v30 }
 0x591   :  { %v505_v55 = vpop.f32.mrf.mxu1  ;;  %v552_v56 = vpop.f32.mrf.mxu0 }
 0x592   :  { %v559_v57 = vmul.f32 0.25, %v552_v56  ;;  %v562_v58 = vsel %vm336_vm3, %v560_v53, -inf }
 0x593   :  { %563 = vmax.xlane.f32.xlu0 %v562_v58  ;;  %v2241_v59 = vpop.f32.mrf.mxu1  ;;  %v2246_v61 = vpop.f32.mrf.mxu0 }
 0x594   :  { %v561_v62 = vadd.f32 %v559_v57, %v2829_v60 }
 0x595   :  { %v555_v63 = vpop.f32.mrf.mxu0 }
 0x596   :  { %v565_v0 = vsel %vm336_vm3, %v561_v62, -inf }
 0x597   :  { %566 = vmax.xlane.f32.xlu1 %v565_v0  ;;  %v2247_v1 = vpop.f32.mrf.mxu0 }
 0x5a8   :  { %634 = vrot.lane.b32.xlu1 %v2810_v48, %s2680_s14 }
 0x61c   :  { %v564_v2 = vpop.xlane.xlu0 %563 }
 0x61d   :  { %v568_v3 = vsub.f32 %v560_v53, %v564_v2 }
 0x61f   :  { %v570_v4 = vmul.f32 1.442695, %v568_v3 }
 0x620   :  { %v567_v5 = vpop.xlane.xlu1 %566 }
 0x621   :  { %2462 = vpow2.f32 %v570_v4  ;;  %v569_v6 = vsub.f32 %v561_v62, %v567_v5 }
 0x623   :  { %v572_v7 = vmul.f32 1.442695, %v569_v6  ;;  %v2429_v6 = vld [vmem:[%s3179_s5] sm:$0xff]  }
 0x624   :  { %v635_v8 = vpop.permute.xlu1 %634 }
 0x625   :  { %2464 = vpow2.f32 %v572_v7  ;;  %v640_v9 = vsel %vm366_vm4, %v635_v8, 0 }
 0x626   :  { %2255 = vmatpush3.bf16.msra.mxu0 %v640_v9 }
 0x627   :  { %2268 = vmatprep.subr.bf16.mxu0 %v2675_v15 }
 0x62e   :  { %v2463_v10 = vpop.eup %2462 }
 0x62f   :  { %v574_v11 = vsel %vm336_vm3, %v2463_v10, 0.0 }
 0x630   :  { %575 = vadd.xlane.f32.xlu0 %v574_v11 }
 0x632   :  { %v2465_v12 = vpop.eup %2464 }
 0x633   :  { %v577_v48 = vsel %vm336_vm3, %v2465_v12, 0.0 }
 0x634   :  { %578 = vadd.xlane.f32.xlu0 %v577_v48  ;;  %v2925_v48 = vsub.s32 2, %v2783_v24 }
 0x64a   :  { %586 = vrot.lane.b32.xlu0 %v2806_v44, %s2680_s14 }
 0x6b9   :  { %v576_v13 = vpop.xlane.xlu0 %575 }
 0x6ba   :  { %2466 = vrcp.f32 %v576_v13 }
 0x6bd   :  { %v579_v14 = vpop.xlane.xlu0 %578 }
 0x6be   :  { %2468 = vrcp.f32 %v579_v14 }
 0x6c1   :  { %v587_v16 = vpop.permute.xlu0 %586 }
 0x6c2   :  { %v592_v17 = vsel %vm366_vm4, %v587_v16, 0  ;;  %v788_v16 = vrot.slane %v2802_v39, %v2925_v48 }
 0x6c3   :  { %2249 = vmatpush3.bf16.msra.mxu1 %v592_v17  ;;  %v2930_v17 = vsub.s32 3, %v2783_v24 }
 0x6c4   :  { %2260 = vmatprep.subr.bf16.mxu1 %v2675_v15 }
 0x6c7   :  { %v2467_v18 = vpop.eup %2466 }
 0x6c8   :  { %v582_v19 = vmul.f32 %v2467_v18, %v2463_v10 }
 0x6ca   :  { %v584_v20 = vpack.c.bf16 %v582_v19, %v582_v19 }
 0x6cb   :  { %v2469_v21 = vpop.eup %2468 }
 0x6cc   :  { %2251 = vmatmul.mubr.msk.bf16.vlgmr.msra.gmra.mxu1 %vm336_vm3, %v584_v20  ;;  %v583_v22 = vmul.f32 %v2469_v21, %v2465_v12  ;;  %v794_v21 = vrot.slane %v2802_v39, %v2930_v17 }
 0x6cd   :  { %2264 = vmatprep.mubr.msk.bf16.mxu1 %vm2676_vm1, %v2675_v15  ;;  %2261 = vmatpush3.bf16.msra.mxu1 %v2426_v23 }
 0x6ce   :  { %v585_v44 = vpack.c.bf16 %v583_v22, %v583_v22  ;;  %2262 = vmatprep.subr.bf16.mxu1 %v2675_v15 }
 0x6d0   :  { %2257 = vmatmul.mubr.msk.bf16.vlgmr.msra.gmra.mxu0 %vm336_vm3, %v585_v44 }
 0x6d1   :  { %2272 = vmatprep.mubr.msk.bf16.mxu0 %vm2676_vm1, %v2675_v15  ;;  %2263 = vmatpush3.bf16.msra.mxu1 %v2427_v26 }
 0x6d2   :  { %2276 = vmatprep.subr.bf16.mxu1 %v2675_v15 }
 0x78c   :  { %v628_v27 = vpop.f32.mrf.mxu1 }
 0x78e   :  { %v2252_v28 = vpop.f32.mrf.mxu1 }
 0x78f   :  { %v2431_v28 = vld [vmem:[%s3180_s6 + $0x10] sm:$0xff]  }
 0x790   :  { %v631_v29 = vpop.f32.mrf.mxu1  ;;  %v676_v31 = vpop.f32.mrf.mxu0 }
 0x791   :  { %v2414_v32 = vpack.i.bf16 %v676_v31, %v628_v27  ;;  %v2430_v27 = vld [vmem:[%s3180_s6 + $0x18] sm:$0xff]   ;;  %v2432_v29 = vld [vmem:[%s3180_s6 + $0x8] sm:$0xff]   ;;  %v2433_v31 = vld [vmem:[%s3180_s6] sm:$0xff]  }
 0x792   :  { %v2253_v33 = vpop.f32.mrf.mxu1  ;;  %v2258_v34 = vpop.f32.mrf.mxu0 }
 0x793   :  { %2415 = vrot.lane.b32.xlu1 %v2414_v32, %s2681_s17  ;;  %v2954_v32 = vsub.s32 4, %v2783_v24 }
 0x794   :  { %v679_v35 = vpop.f32.mrf.mxu0 }
 0x795   :  { %v805_v33 = vrot.slane %v2802_v39, %v2954_v32 }
 0x796   :  { %v2259_v38 = vpop.f32.mrf.mxu0 }
 0x805   :  { %v2416_v41 = vpop.permute.xlu1 %2415 }
 0x806   :  { %v2418_v42 = vunpack.i.h.bf16 %v2416_v41  ;;  %v2417_v45 = vunpack.i.l.bf16 %v2416_v41 }
 0x808   :  { %v691_v46 = vsel %vm236_vm2, %v2870_v43, %v2418_v42  ;;  %v690_v47 = vsel %vm236_vm2, %v2868_v40, %v2417_v45 }
 0x809   :  { %v696_v49 = vpack.c.bf16 %v691_v46, %v690_v47 }
 0x80b   :  { %2265 = vmatmul.mubr.msk.bf16.vlgmr.msra.gmra.mxu1 %vm125_vm0, %v696_v49 }
 0x80c   :  { %2284 = vmatprep.mubr.msk.bf16.mxu1 %vm2676_vm1, %v2675_v15  ;;  %2277 = vmatpush3.bf16.msra.mxu1 %v2430_v27 }
 0x80d   :  { %2278 = vmatprep.subr.bf16.mxu1 %v2675_v15 }
 0x810   :  { %2279 = vmatpush3.bf16.msra.mxu1 %v2431_v28 }
 0x811   :  { %2280 = vmatprep.subr.bf16.mxu1 %v2675_v15 }
 0x814   :  { %2281 = vmatpush3.bf16.msra.mxu1 %v2432_v29 }
 0x815   :  { %2282 = vmatprep.subr.bf16.mxu1 %v2675_v15 }
 0x818   :  { %2283 = vmatpush3.bf16.msra.mxu1 %v2433_v31 }
 0x819   :  { %2302 = vmatprep.subr.bf16.mxu1 %v2675_v15 }
 0x8cb   :  { %v750_v51 = vpop.f32.mrf.mxu1 }
 0x8cc   :  { %v751_v52 = vadd.f32 %v750_v51, %v700_v50 }
 0x8cd   :  { %v2266_v53 = vpop.f32.mrf.mxu1 }
 0x8ce   :  { %v757_v55 = vadd.f32 %v751_v52, %v2793_v36 }
 0x8cf   :  { %v753_v56 = vpop.f32.mrf.mxu1 }
 0x8d0   :  { %v754_v57 = vadd.f32 %v753_v56, %v700_v50  ;;  %v759_v43 = vsel %vm125_vm0, %v757_v55, 0.0 }
 0x8d1   :  { %760 = vadd.xlane.f32.xlu1 %v759_v43  ;;  %v2267_v40 = vpop.f32.mrf.mxu1 }
 0x8d2   :  { %v758_v58 = vadd.f32 %v754_v57, %v2795_v37  ;;  %v2428_v37 = vld [vmem:[%s3179_s5 + $0x8] sm:$0xff]  }
 0x8d3   :  { %2269 = vmatpush3.bf16.msra.mxu0 %v2428_v37 }
 0x8d4   :  { %v762_v59 = vsel %vm125_vm0, %v758_v58, 0.0  ;;  %2270 = vmatprep.subr.bf16.mxu0 %v2675_v15 }
 0x8d5   :  { %763 = vadd.xlane.f32.xlu0 %v762_v59 }
 0x8d7   :  { %2271 = vmatpush3.bf16.msra.mxu0 %v2429_v6 }
 0x8d8   :  { %2288 = vmatprep.subr.bf16.mxu0 %v2675_v15 }
 0x95a   :  { %v761_v61 = vpop.xlane.xlu1 %760 }
 0x95b   :  { %v765_v62 = vmul.f32 0.03125, %v761_v61 }
 0x95d   :  { %v767_v63 = vsub.f32 %v757_v55, %v765_v62 }
 0x95e   :  { %v764_v0 = vpop.xlane.xlu0 %763 }
 0x95f   :  { %v766_v1 = vmul.f32 0.03125, %v764_v0  ;;  %v769_v2 = vmul.f32 %v767_v63, %v767_v63 }
 0x961   :  { %v768_v3 = vsub.f32 %v758_v58, %v766_v1  ;;  %v771_v36 = vsel %vm125_vm0, %v769_v2, 0.0  ;;  %v891_v2 = vsub.s32 5, %v2783_v24 }
 0x962   :  { %772 = vadd.xlane.f32.xlu0 %v771_v36 }
 0x963   :  { %v770_v4 = vmul.f32 %v768_v3, %v768_v3 }
 0x965   :  { %v774_v5 = vsel %vm125_vm0, %v770_v4, 0.0 }
 0x966   :  { %775 = vadd.xlane.f32.xlu0 %v774_v5 }
 0x9eb   :  { %v773_v7 = vpop.xlane.xlu0 %772 }
 0x9ec   :  { %v777_v8 = vmul.f32 0.03125, %v773_v7 }
 0x9ee   :  { %v779_v9 = vadd.f32 1e-12, %v777_v8 }
 0x9ef   :  { %v776_v10 = vpop.xlane.xlu0 %775 }
 0x9f0   :  { %2470 = vrsqrt.f32 %v779_v9  ;;  %v778_v11 = vmul.f32 0.03125, %v776_v10 }
 0x9f2   :  { %v780_v12 = vadd.f32 1e-12, %v778_v11 }
 0x9f4   :  { %2472 = vrsqrt.f32 %v780_v12 }
 0x9fd   :  { %v2471_v13 = vpop.eup %2470 }
 0x9fe   :  { %v783_v14 = vmul.f32 %v2471_v13, %v767_v63 }
 0xa00   :  { %v789_v20 = vmul.f32 %v788_v16, %v783_v14 }
 0xa01   :  { %v2473_v18 = vpop.eup %2472 }
 0xa02   :  { %v784_v19 = vmul.f32 %v2473_v18, %v768_v3  ;;  %v795_v44 = vadd.f32 %v794_v21, %v789_v20  ;;  %v892_v3 = vrot.slane %v2802_v39, %v891_v2 }
 0xa04   :  { %v790_v22 = vmul.f32 %v788_v16, %v784_v19 }
 0xa06   :  { %v796_v23 = vadd.f32 %v794_v21, %v790_v22 }
 0xa08   :  { %v801_v26 = vpack.c.bf16 %v796_v23, %v795_v44 }
 0xa0a   :  { %2273 = vmatmul.mubr.msk.bf16.vlgmr.msra.gmra.mxu0 %vm125_vm0, %v801_v26  ;;  %v2435_v26 = vld [vmem:[%s3177_s3 + $0x10] sm:$0xff]  }
 0xa0b   :  { %2292 = vmatprep.mubr.msk.bf16.mxu0 %vm2676_vm1, %v2675_v15 }
 0xaca   :  { %v855_v34 = vpop.f32.mrf.mxu0 }
 0xacb   :  { %v856_v35 = vadd.f32 %v855_v34, %v805_v33 }
 0xacc   :  { %v2274_v38 = vpop.f32.mrf.mxu0 }
 0xacd   :  { %v862_v41 = vmul.f32 %v856_v35, %v856_v35 }
 0xace   :  { %v858_v42 = vpop.f32.mrf.mxu0 }
 0xacf   :  { %v864_v45 = vmul.f32 %v862_v41, %v856_v35  ;;  %v859_v46 = vadd.f32 %v858_v42, %v805_v33 }
 0xad0   :  { %v2275_v47 = vpop.f32.mrf.mxu0 }
 0xad1   :  { %v866_v49 = vmul.f32 0.044715, %v864_v45  ;;  %v863_v50 = vmul.f32 %v859_v46, %v859_v46  ;;  %v998_v45 = vsub.s32 7, %v2783_v24 }
 0xad3   :  { %v868_v51 = vadd.f32 %v866_v49, %v856_v35  ;;  %v865_v52 = vmul.f32 %v863_v50, %v859_v46  ;;  %v999_v50 = vrot.slane %v2802_v39, %v998_v45 }
 0xad5   :  { %v870_v53 = vmul.f32 0.7978846, %v868_v51  ;;  %v867_v55 = vmul.f32 0.044715, %v865_v52 }
 0xad7   :  { %2474 = vtanh.f32 %v870_v53  ;;  %v869_v56 = vadd.f32 %v867_v55, %v859_v46 }
 0xad9   :  { %v871_v57 = vmul.f32 0.7978846, %v869_v56  ;;  %v2994_v56 = vld [vmem:[#allocation8 + $0x8] sm:$0xff] }
 0xadb   :  { %2476 = vtanh.f32 %v871_v57  ;;  %v1013_v57 = vrot.slane %v2994_v56, %v2786_v25 }
 0xae4   :  { %v2475_v43 = vpop.eup %2474 }
 0xae5   :  { %v874_v40 = vadd.f32 1.0, %v2475_v43 }
 0xae7   :  { %v876_v59 = vmul.f32 0.5, %v874_v40 }
 0xae8   :  { %v2477_v58 = vpop.eup %2476 }
 0xae9   :  { %v875_v61 = vadd.f32 1.0, %v2477_v58  ;;  %v878_v63 = vmul.f32 %v876_v59, %v856_v35  ;;  %v992_v35 = vsub.s32 6, %v2783_v24  ;;  %v2446_v24 = vld [vmem:[%s3183_s9 + $0x8] sm:$0xff]  }
 0xaeb   :  { %v877_v62 = vmul.f32 0.5, %v875_v61  ;;  %v993_v42 = vrot.slane %v2802_v39, %v992_v35 }
 0xaed   :  { %v879_v0 = vmul.f32 %v877_v62, %v859_v46 }
 0xaef   :  { %v888_v1 = vpack.c.bf16 %v879_v0, %v878_v63 }
 0xaf1   :  { %2285 = vmatmul.mubr.msk.bf16.vlgmr.msra.gmra.mxu1 %vm917_vm5, %v888_v1 }
 0xaf2   :  { %2304 = vmatprep.mubr.msk.bf16.mxu1 %vm2676_vm1, %v2675_v15 }
 0xbb1   :  { %v955_v36 = vpop.f32.mrf.mxu1 }
 0xbb2   :  { %v956_v4 = vadd.f32 %v955_v36, %v892_v3 }
 0xbb3   :  { %v2286_v5 = vpop.f32.mrf.mxu1 }
 0xbb4   :  { %v962_v37 = vadd.f32 %v956_v4, %v795_v44 }
 0xbb5   :  { %v958_v6 = vpop.f32.mrf.mxu1 }
 0xbb6   :  { %v959_v7 = vadd.f32 %v958_v6, %v892_v3  ;;  %v964_v8 = vsel %vm125_vm0, %v962_v37, 0.0 }
 0xbb7   :  { %965 = vadd.xlane.f32.xlu1 %v964_v8  ;;  %v2287_v9 = vpop.f32.mrf.mxu1 }
 0xbb8   :  { %v963_v10 = vadd.f32 %v959_v7, %v796_v23  ;;  %v2434_v23 = vld [vmem:[%s3177_s3 + $0x18] sm:$0xff]  }
 0xbb9   :  { %2289 = vmatpush3.bf16.msra.mxu0 %v2434_v23 }
 0xbba   :  { %v967_v11 = vsel %vm125_vm0, %v963_v10, 0.0  ;;  %2290 = vmatprep.subr.bf16.mxu0 %v2675_v15 }
 0xbbb   :  { %968 = vadd.xlane.f32.xlu0 %v967_v11 }
 0xbbd   :  { %2291 = vmatpush3.bf16.msra.mxu0 %v2435_v26 }
 0xbbe   :  { %2296 = vmatprep.subr.bf16.mxu0 %v2675_v15 }
 0xc40   :  { %v966_v12 = vpop.xlane.xlu1 %965 }
 0xc41   :  { %v970_v13 = vmul.f32 0.03125, %v966_v12 }
 0xc43   :  { %v972_v14 = vsub.f32 %v962_v37, %v970_v13 }
 0xc44   :  { %v969_v16 = vpop.xlane.xlu0 %968 }
 0xc45   :  { %v971_v18 = vmul.f32 0.03125, %v969_v16  ;;  %v974_v19 = vmul.f32 %v972_v14, %v972_v14 }
 0xc47   :  { %v973_v20 = vsub.f32 %v963_v10, %v971_v18  ;;  %v976_v21 = vsel %vm125_vm0, %v974_v19, 0.0 }
 0xc48   :  { %977 = vadd.xlane.f32.xlu1 %v976_v21 }
 0xc49   :  { %v975_v22 = vmul.f32 %v973_v20, %v973_v20 }
 0xc4b   :  { %v979_v44 = vsel %vm125_vm0, %v975_v22, 0.0 }
 0xc4c   :  { %980 = vadd.xlane.f32.xlu0 %v979_v44 }
 0xcd1   :  { %v978_v27 = vpop.xlane.xlu1 %977 }
 0xcd2   :  { %v982_v28 = vmul.f32 0.03125, %v978_v27 }
 0xcd4   :  { %v984_v29 = vadd.f32 1e-12, %v982_v28 }
 0xcd5   :  { %v981_v31 = vpop.xlane.xlu0 %980 }
 0xcd6   :  { %2478 = vrsqrt.f32 %v984_v29  ;;  %v983_v33 = vmul.f32 0.03125, %v981_v31 }
 0xcd8   :  { %v985_v34 = vadd.f32 1e-12, %v983_v33 }
 0xcda   :  { %2480 = vrsqrt.f32 %v985_v34 }
 0xce3   :  { %v2479_v38 = vpop.eup %2478 }
 0xce4   :  { %v988_v41 = vmul.f32 %v2479_v38, %v972_v14 }
 0xce6   :  { %v994_v49 = vmul.f32 %v993_v42, %v988_v41 }
 0xce7   :  { %v2481_v46 = vpop.eup %2480 }
 0xce8   :  { %v989_v47 = vmul.f32 %v2481_v46, %v973_v20  ;;  %v2985_v52 = vadd.f32 %v999_v50, %v994_v49 }
 0xcea   :  { %v995_v51 = vmul.f32 %v993_v42, %v989_v47 }
 0xcec   :  { %v2987_v53 = vadd.f32 %v999_v50, %v995_v51 }
 0xcee   :  { %v1009_v55 = vpack.c.bf16 %v2987_v53, %v2985_v52 }
 0xcf0   :  { %2293 = vmatmul.mubr.msk.bf16.vlgmr.msra.gmra.mxu0 %vm125_vm0, %v1009_v55 }
 0xcf1   :  { %2298 = vmatprep.mubr.msk.bf16.mxu0 %vm2676_vm1, %v2675_v15 }
 0xdb0   :  { %v1063_v43 = vpop.f32.mrf.mxu0 }
 0xdb1   :  { %v1064_v39 = vadd.f32 %v1063_v43, %v1013_v57 }
 0xdb2   :  { %v2294_v40 = vpop.f32.mrf.mxu0 }
 0xdb3   :  { %v2998_v58 = vpack.c.bf16 %v1064_v39, %v1064_v39 }
 0xdb4   :  { %v1066_v59 = vpop.f32.mrf.mxu0 }
 0xdb5   :  { %v1067_v61 = vadd.f32 %v1066_v59, %v1013_v57  ;;  %1073 = vrot.lane.b32.xlu1 %v2998_v58, %s2677_s30 }
 0xdb6   :  { %v2295_v62 = vpop.f32.mrf.mxu0 }
 0xdb7   :  { %v3002_v63 = vpack.c.bf16 %v1067_v61, %v1067_v61 }
 0xdb9   :  { %1122 = vrot.lane.b32.xlu0 %v3002_v63, %s2677_s30 }
 0xe27   :  { %v1074_v0 = vpop.permute.xlu1 %1073 }
 0xe28   :  { %v1079_v1 = vsel %vm236_vm2, %v1074_v0, 0 }
 0xe29   :  { %2297 = vmatpush3.bf16.xpose.msra.mxu0 %v1079_v1 }
 0xe2a   :  { %2308 = vmatprep.subr.bf16.mxu0 %v2675_v15 }
 0xe2b   :  { %v1123_v25 = vpop.permute.xlu0 %1122 }
 0xe2c   :  { %v1128_v3 = vsel %vm236_vm2, %v1123_v25, 0 }
 0xe2d   :  { %2303 = vmatpush3.bf16.xpose.msra.mxu1 %v1128_v3 }
 0xe2e   :  { %2314 = vmatprep.subr.bf16.mxu1 %v2675_v15 }
 0xe30   :  { %2299 = vmatmul.mubr.msk.bf16.vlgmr.msra.gmra.mxu0 %vm236_vm2, %v2998_v58 }
 0xe31   :  { %2310 = vmatprep.mubr.msk.bf16.mxu0 %vm2676_vm1, %v2675_v15 }
 0xe34   :  { %2305 = vmatmul.mubr.msk.bf16.vlgmr.msra.gmra.mxu1 %vm236_vm2, %v3002_v63 }
 0xe35   :  { %2316 = vmatprep.mubr.msk.bf16.mxu1 %vm2676_vm1, %v2675_v15 }
 0xef0   :  { %v1115_v36 = vpop.f32.mrf.mxu0 }
 0xef1   :  { %v1170_v4 = vmul.f32 0.25, %v1115_v36 }
 0xef2   :  { %v2300_v5 = vpop.f32.mrf.mxu0 }
 0xef3   :  { %v1172_v37 = vadd.f32 %v1170_v4, %v2826_v54 }
 0xef4   :  { %v1118_v6 = vpop.f32.mrf.mxu0  ;;  %v1164_v7 = vpop.f32.mrf.mxu1 }
 0xef5   :  { %v1171_v8 = vmul.f32 0.25, %v1164_v7  ;;  %v1174_v9 = vsel %vm336_vm3, %v1172_v37, -inf }
 0xef6   :  { %v2306_v10 = vpop.f32.mrf.mxu1  ;;  %1175 = vmax.xlane.f32.xlu1 %v1174_v9  ;;  %v2301_v11 = vpop.f32.mrf.mxu0 }
 0xef7   :  { %v1173_v12 = vadd.f32 %v1171_v8, %v2829_v60 }
 0xef8   :  { %v1167_v13 = vpop.f32.mrf.mxu1 }
 0xef9   :  { %v1177_v14 = vsel %vm336_vm3, %v1173_v12, -inf }
 0xefa   :  { %1178 = vmax.xlane.f32.xlu0 %v1177_v14  ;;  %v2307_v16 = vpop.f32.mrf.mxu1 }
 0xf07   :  { %1198 = vrot.lane.b32.xlu1 %v2998_v58, %s2672_s0 }
 0xf7f   :  { %v1176_v18 = vpop.xlane.xlu1 %1175 }
 0xf80   :  { %v1180_v19 = vsub.f32 %v1172_v37, %v1176_v18 }
 0xf82   :  { %v1182_v20 = vmul.f32 1.442695, %v1180_v19 }
 0xf83   :  { %v1179_v21 = vpop.xlane.xlu0 %1178  ;;  %v1199_v22 = vpop.permute.xlu1 %1198 }
 0xf84   :  { %2482 = vpow2.f32 %v1182_v20  ;;  %v1181_v44 = vsub.f32 %v1173_v12, %v1179_v21  ;;  %v1204_v23 = vsel %vm366_vm4, %v1199_v22, 0 }
 0xf85   :  { %2309 = vmatpush3.bf16.msra.mxu0 %v1204_v23 }
 0xf86   :  { %v1184_v26 = vmul.f32 1.442695, %v1181_v44  ;;  %2320 = vmatprep.subr.bf16.mxu0 %v2675_v15 }
 0xf88   :  { %2484 = vpow2.f32 %v1184_v26 }
 0xf91   :  { %v2483_v27 = vpop.eup %2482 }
 0xf92   :  { %v1186_v28 = vsel %vm336_vm3, %v2483_v27, 0.0 }
 0xf93   :  { %1187 = vadd.xlane.f32.xlu1 %v1186_v28 }
 0xf95   :  { %v2485_v29 = vpop.eup %2484 }
 0xf96   :  { %v1189_v31 = vsel %vm336_vm3, %v2485_v29, 0.0 }
 0xf97   :  { %1190 = vadd.xlane.f32.xlu0 %v1189_v31 }
 0xfa4   :  { %1296 = vrot.lane.b32.xlu1 %v2998_v58, %s2678_s12 }
 0xfa8   :  { %1346 = vrot.lane.b32.xlu1 %v3002_v63, %s2678_s12 }
 0xfac   :  { %1294 = vrot.lane.b32.xlu1 %v2998_v58, %s2679_s13 }
 0xfad   :  { %1246 = vrot.lane.b32.xlu0 %v3002_v63, %s2672_s0 }
 0xfb1   :  { %1344 = vrot.lane.b32.xlu0 %v3002_v63, %s2679_s13 }
0x101c   :  { %v1188_v33 = vpop.xlane.xlu1 %1187 }
0x101d   :  { %2486 = vrcp.f32 %v1188_v33 }
0x1020   :  { %v1191_v34 = vpop.xlane.xlu0 %1190  ;;  %v1297_v46 = vpop.permute.xlu1 %1296 }
0x1021   :  { %2488 = vrcp.f32 %v1191_v34  ;;  %v1302_v51 = vsel %vm236_vm2, %v1297_v46, 0 }
0x1024   :  { %v1247_v38 = vpop.permute.xlu0 %1246  ;;  %v1347_v57 = vpop.permute.xlu1 %1346 }
0x1025   :  { %v1252_v41 = vsel %vm366_vm4, %v1247_v38, 0  ;;  %v1352_v39 = vsel %vm236_vm2, %v1347_v57, 0 }
0x1026   :  { %2315 = vmatpush3.bf16.msra.mxu1 %v1252_v41 }
0x1027   :  { %2326 = vmatprep.subr.bf16.mxu1 %v2675_v15 }
0x1028   :  { %v1295_v40 = vpop.permute.xlu1 %1294  ;;  %v1345_v59 = vpop.permute.xlu0 %1344 }
0x102a   :  { %v2487_v42 = vpop.eup %2486 }
0x102b   :  { %v1194_v47 = vmul.f32 %v2487_v42, %v2483_v27 }
0x102d   :  { %v1196_v49 = vpack.c.bf16 %v1194_v47, %v1194_v47 }
0x102e   :  { %v2489_v50 = vpop.eup %2488 }
0x102f   :  { %2311 = vmatmul.mubr.msk.bf16.vlgmr.msra.gmra.mxu0 %vm336_vm3, %v1196_v49  ;;  %v1195_v55 = vmul.f32 %v2489_v50, %v2485_v29  ;;  %v2436_v50 = vld [vmem:[%s3178_s4 + $0x18] sm:$0xff]  }
0x1030   :  { %2321 = vmatpush3.bf16.xpose.msra.mxu0 %v1302_v51  ;;  %2322 = vmatprep.mubr.msk.bf16.mxu0 %vm2676_vm1, %v2675_v15  ;;  %v2437_v51 = vld [vmem:[%s3178_s4 + $0x10] sm:$0xff]  }
0x1031   :  { %v1197_v43 = vpack.c.bf16 %v1195_v55, %v1195_v55  ;;  %2332 = vmatprep.subr.bf16.mxu0 %v2675_v15 }
0x1033   :  { %2317 = vmatmul.mubr.msk.bf16.vlgmr.msra.gmra.mxu1 %vm336_vm3, %v1197_v43 }
0x1034   :  { %2327 = vmatpush3.bf16.xpose.msra.mxu1 %v1352_v39  ;;  %2328 = vmatprep.mubr.msk.bf16.mxu1 %vm2676_vm1, %v2675_v15 }
0x1035   :  { %2338 = vmatprep.subr.bf16.mxu1 %v2675_v15 }
0x1037   :  { %2323 = vmatmul.mubr.msk.bf16.vlgmr.msra.gmra.mxu0 %vm236_vm2, %v1295_v40 }
0x1038   :  { %2334 = vmatprep.mubr.msk.bf16.mxu0 %vm2676_vm1, %v2675_v15 }
0x103b   :  { %2329 = vmatmul.mubr.msk.bf16.vlgmr.msra.gmra.mxu1 %vm236_vm2, %v1345_v59 }
0x103c   :  { %2340 = vmatprep.mubr.msk.bf16.mxu1 %vm2676_vm1, %v2675_v15 }
0x10ef   :  { %v3056_v61 = vpop.f32.mrf.mxu0 }
0x10f1   :  { %v2312_v62 = vpop.f32.mrf.mxu0 }
0x10f3   :  { %v1243_v0 = vpop.f32.mrf.mxu0  ;;  %v3058_v1 = vpop.f32.mrf.mxu1 }
0x10f5   :  { %v2313_v25 = vpop.f32.mrf.mxu0  ;;  %v2318_v3 = vpop.f32.mrf.mxu1 }
0x10f7   :  { %v1291_v36 = vpop.f32.mrf.mxu1  ;;  %v1338_v4 = vpop.f32.mrf.mxu0 }
0x10f8   :  { %v1394_v5 = vmul.f32 0.25, %v1338_v4 }
0x10f9   :  { %v2319_v37 = vpop.f32.mrf.mxu1  ;;  %v2324_v6 = vpop.f32.mrf.mxu0 }
0x10fa   :  { %v1396_v7 = vadd.f32 %v1394_v5, %v2826_v54 }
0x10fb   :  { %v1341_v8 = vpop.f32.mrf.mxu0  ;;  %v1388_v9 = vpop.f32.mrf.mxu1 }
0x10fc   :  { %v1395_v10 = vmul.f32 0.25, %v1388_v9  ;;  %v1398_v11 = vsel %vm336_vm3, %v1396_v7, -inf }
0x10fd   :  { %v2330_v12 = vpop.f32.mrf.mxu1  ;;  %1399 = vmax.xlane.f32.xlu1 %v1398_v11  ;;  %v2325_v13 = vpop.f32.mrf.mxu0 }
0x10fe   :  { %v1397_v14 = vadd.f32 %v1395_v10, %v2829_v60 }
0x10ff   :  { %v1391_v16 = vpop.f32.mrf.mxu1 }
0x1100   :  { %v1401_v18 = vsel %vm336_vm3, %v1397_v14, -inf }
0x1101   :  { %1402 = vmax.xlane.f32.xlu0 %v1401_v18  ;;  %v2331_v19 = vpop.f32.mrf.mxu1 }
0x110e   :  { %1422 = vrot.lane.b32.xlu1 %v2998_v58, %s2680_s14 }
0x1186   :  { %v1400_v20 = vpop.xlane.xlu1 %1399 }
0x1187   :  { %v1404_v54 = vsub.f32 %v1396_v7, %v1400_v20  ;;  %v1537_v7 = vrot.slane %v2994_v56, %v2790_v30 }
0x1189   :  { %v1406_v21 = vmul.f32 1.442695, %v1404_v54 }
0x118a   :  { %v1403_v22 = vpop.xlane.xlu0 %1402  ;;  %v1423_v44 = vpop.permute.xlu1 %1422 }
0x118b   :  { %2490 = vpow2.f32 %v1406_v21  ;;  %v1405_v23 = vsub.f32 %v1397_v14, %v1403_v22  ;;  %v1428_v26 = vsel %vm366_vm4, %v1423_v44, 0 }
0x118c   :  { %2333 = vmatpush3.bf16.msra.mxu0 %v1428_v26  ;;  %v2439_v26 = vld [vmem:[%s3179_s5 + $0x10] sm:$0xff]  }
0x118d   :  { %v1408_v27 = vmul.f32 1.442695, %v1405_v23  ;;  %2344 = vmatprep.subr.bf16.mxu0 %v2675_v15 }
0x118f   :  { %2492 = vpow2.f32 %v1408_v27 }
0x1198   :  { %v2491_v60 = vpop.eup %2490 }
0x1199   :  { %v1410_v28 = vsel %vm336_vm3, %v2491_v60, 0.0 }
0x119a   :  { %1411 = vadd.xlane.f32.xlu0 %v1410_v28 }
0x119c   :  { %v2493_v29 = vpop.eup %2492 }
0x119d   :  { %v1413_v58 = vsel %vm336_vm3, %v2493_v29, 0.0 }
0x119e   :  { %1414 = vadd.xlane.f32.xlu0 %v1413_v58 }
0x11b4   :  { %1470 = vrot.lane.b32.xlu0 %v3002_v63, %s2680_s14 }
0x1223   :  { %v1412_v31 = vpop.xlane.xlu0 %1411 }
0x1224   :  { %2494 = vrcp.f32 %v1412_v31 }
0x1227   :  { %v1415_v33 = vpop.xlane.xlu0 %1414 }
0x1228   :  { %2496 = vrcp.f32 %v1415_v33 }
0x122b   :  { %v1471_v34 = vpop.permute.xlu0 %1470 }
0x122c   :  { %v1476_v38 = vsel %vm366_vm4, %v1471_v34, 0 }
0x122d   :  { %2339 = vmatpush3.bf16.msra.mxu1 %v1476_v38  ;;  %v1625_v38 = vrot.slane %v2994_v56, %v2925_v48 }
0x122e   :  { %2352 = vmatprep.subr.bf16.mxu1 %v2675_v15 }
0x1231   :  { %v2495_v41 = vpop.eup %2494 }
0x1232   :  { %v1418_v42 = vmul.f32 %v2495_v41, %v2491_v60 }
0x1234   :  { %v1420_v46 = vpack.c.bf16 %v1418_v42, %v1418_v42 }
0x1235   :  { %v2497_v47 = vpop.eup %2496 }
0x1236   :  { %2335 = vmatmul.mubr.msk.bf16.vlgmr.msra.gmra.mxu0 %vm336_vm3, %v1420_v46  ;;  %v1419_v49 = vmul.f32 %v2497_v47, %v2493_v29  ;;  %v1631_v47 = vrot.slane %v2994_v56, %v2930_v17 }
0x1237   :  { %2348 = vmatprep.mubr.msk.bf16.mxu0 %vm2676_vm1, %v2675_v15  ;;  %2345 = vmatpush3.bf16.msra.mxu0 %v2436_v50 }
0x1238   :  { %v1421_v63 = vpack.c.bf16 %v1419_v49, %v1419_v49  ;;  %2346 = vmatprep.subr.bf16.mxu0 %v2675_v15 }
0x123a   :  { %2341 = vmatmul.mubr.msk.bf16.vlgmr.msra.gmra.mxu1 %vm336_vm3, %v1421_v63 }
0x123b   :  { %2356 = vmatprep.mubr.msk.bf16.mxu1 %vm2676_vm1, %v2675_v15  ;;  %2347 = vmatpush3.bf16.msra.mxu0 %v2437_v51 }
0x123c   :  { %2360 = vmatprep.subr.bf16.mxu0 %v2675_v15 }
0x12f6   :  { %v1464_v55 = vpop.f32.mrf.mxu0 }
0x12f8   :  { %v2336_v57 = vpop.f32.mrf.mxu0 }
0x12f9   :  { %v2441_v57 = vld [vmem:[%s3180_s6 + $0x30] sm:$0xff]  }
0x12fa   :  { %v1467_v43 = vpop.f32.mrf.mxu0  ;;  %v1512_v39 = vpop.f32.mrf.mxu1 }
0x12fb   :  { %v2419_v40 = vpack.i.bf16 %v1512_v39, %v1464_v55  ;;  %v2440_v55 = vld [vmem:[%s3180_s6 + $0x38] sm:$0xff]   ;;  %v2442_v43 = vld [vmem:[%s3180_s6 + $0x28] sm:$0xff]   ;;  %v2443_v39 = vld [vmem:[%s3180_s6 + $0x20] sm:$0xff]  }
0x12fc   :  { %v2337_v59 = vpop.f32.mrf.mxu0  ;;  %v2342_v62 = vpop.f32.mrf.mxu1 }
0x12fd   :  { %2420 = vrot.lane.b32.xlu1 %v2419_v40, %s2681_s17  ;;  %v1643_v40 = vrot.slane %v2994_v56, %v2954_v32 }
0x12fe   :  { %v1515_v0 = vpop.f32.mrf.mxu1 }
0x1300   :  { %v2343_v25 = vpop.f32.mrf.mxu1 }
0x136f   :  { %v2421_v3 = vpop.permute.xlu1 %2420 }
0x1370   :  { %v2423_v36 = vunpack.i.h.bf16 %v2421_v3  ;;  %v2422_v4 = vunpack.i.l.bf16 %v2421_v3 }
0x1372   :  { %v1527_v5 = vsel %vm236_vm2, %v3058_v1, %v2423_v36  ;;  %v1526_v37 = vsel %vm236_vm2, %v3056_v61, %v2422_v4 }
0x1373   :  { %v1533_v6 = vpack.c.bf16 %v1527_v5, %v1526_v37 }
0x1375   :  { %2349 = vmatmul.mubr.msk.bf16.vlgmr.msra.gmra.mxu0 %vm125_vm0, %v1533_v6 }
0x1376   :  { %2368 = vmatprep.mubr.msk.bf16.mxu0 %vm2676_vm1, %v2675_v15  ;;  %2361 = vmatpush3.bf16.msra.mxu0 %v2440_v55 }
0x1377   :  { %2362 = vmatprep.subr.bf16.mxu0 %v2675_v15 }
0x137a   :  { %2363 = vmatpush3.bf16.msra.mxu0 %v2441_v57 }
0x137b   :  { %2364 = vmatprep.subr.bf16.mxu0 %v2675_v15 }
0x137e   :  { %2365 = vmatpush3.bf16.msra.mxu0 %v2442_v43 }
0x137f   :  { %2366 = vmatprep.subr.bf16.mxu0 %v2675_v15 }
0x1382   :  { %2367 = vmatpush3.bf16.msra.mxu0 %v2443_v39  ;;  %v1831_v39 = vrot.slane %v2994_v56, %v992_v35 }
0x1383   :  { %2388 = vmatprep.subr.bf16.mxu0 %v2675_v15 }
0x1435   :  { %v1587_v8 = vpop.f32.mrf.mxu0 }
0x1436   :  { %v1588_v9 = vadd.f32 %v1587_v8, %v1537_v7 }
0x1437   :  { %v2350_v10 = vpop.f32.mrf.mxu0 }
0x1438   :  { %v1594_v11 = vadd.f32 %v1588_v9, %v2985_v52 }
0x1439   :  { %v1590_v12 = vpop.f32.mrf.mxu0 }
0x143a   :  { %v1591_v13 = vadd.f32 %v1590_v12, %v1537_v7  ;;  %v1596_v1 = vsel %vm125_vm0, %v1594_v11, 0.0 }
0x143b   :  { %1597 = vadd.xlane.f32.xlu1 %v1596_v1  ;;  %v2351_v61 = vpop.f32.mrf.mxu0 }
0x143c   :  { %v1595_v14 = vadd.f32 %v1591_v13, %v2987_v53  ;;  %v2438_v53 = vld [vmem:[%s3179_s5 + $0x18] sm:$0xff]  }
0x143d   :  { %2353 = vmatpush3.bf16.msra.mxu1 %v2438_v53 }
0x143e   :  { %v1599_v16 = vsel %vm125_vm0, %v1595_v14, 0.0  ;;  %2354 = vmatprep.subr.bf16.mxu1 %v2675_v15 }
0x143f   :  { %1600 = vadd.xlane.f32.xlu0 %v1599_v16 }
0x1441   :  { %2355 = vmatpush3.bf16.msra.mxu1 %v2439_v26 }
0x1442   :  { %2372 = vmatprep.subr.bf16.mxu1 %v2675_v15 }
0x14c4   :  { %v1598_v18 = vpop.xlane.xlu1 %1597 }
0x14c5   :  { %v1602_v19 = vmul.f32 0.03125, %v1598_v18 }
0x14c7   :  { %v1604_v20 = vsub.f32 %v1594_v11, %v1602_v19 }
0x14c8   :  { %v1601_v30 = vpop.xlane.xlu0 %1600 }
0x14c9   :  { %v1603_v54 = vmul.f32 0.03125, %v1601_v30  ;;  %v1606_v21 = vmul.f32 %v1604_v20, %v1604_v20 }
0x14cb   :  { %v1605_v22 = vsub.f32 %v1595_v14, %v1603_v54  ;;  %v1608_v52 = vsel %vm125_vm0, %v1606_v21, 0.0  ;;  %v1731_v54 = vrot.slane %v2994_v56, %v891_v2 }
0x14cc   :  { %1609 = vadd.xlane.f32.xlu0 %v1608_v52 }
0x14cd   :  { %v1607_v44 = vmul.f32 %v1605_v22, %v1605_v22 }
0x14cf   :  { %v1611_v23 = vsel %vm125_vm0, %v1607_v44, 0.0 }
0x14d0   :  { %1612 = vadd.xlane.f32.xlu1 %v1611_v23 }
0x1555   :  { %v1610_v27 = vpop.xlane.xlu0 %1609 }
0x1556   :  { %v1614_v60 = vmul.f32 0.03125, %v1610_v27 }
0x1558   :  { %v1616_v28 = vadd.f32 1e-12, %v1614_v60 }
0x1559   :  { %v1613_v29 = vpop.xlane.xlu1 %1612 }
0x155a   :  { %2498 = vrsqrt.f32 %v1616_v28  ;;  %v1615_v58 = vmul.f32 0.03125, %v1613_v29 }
0x155c   :  { %v1617_v31 = vadd.f32 1e-12, %v1615_v58 }
0x155e   :  { %2500 = vrsqrt.f32 %v1617_v31 }
0x1567   :  { %v2499_v33 = vpop.eup %2498 }
0x1568   :  { %v1620_v34 = vmul.f32 %v2499_v33, %v1604_v20 }
0x156a   :  { %v1626_v46 = vmul.f32 %v1625_v38, %v1620_v34 }
0x156b   :  { %v2501_v41 = vpop.eup %2500 }
0x156c   :  { %v1621_v42 = vmul.f32 %v2501_v41, %v1605_v22  ;;  %v1632_v63 = vadd.f32 %v1631_v47, %v1626_v46 }
0x156e   :  { %v1627_v49 = vmul.f32 %v1625_v38, %v1621_v42 }
0x1570   :  { %v1633_v50 = vadd.f32 %v1631_v47, %v1627_v49  ;;  %v2444_v47 = vld [vmem:[#allocation10 + $0x8] sm:$0xff]   ;;  %v2445_v49 = vld [vmem:[#allocation10] sm:$0xff]  }
0x1572   :  { %v1639_v51 = vpack.c.bf16 %v1633_v50, %v1632_v63 }
0x1574   :  { %2357 = vmatmul.mubr.msk.bf16.vlgmr.msra.gmra.mxu1 %vm125_vm0, %v1639_v51 }
0x1575   :  { %2376 = vmatprep.mubr.msk.bf16.mxu1 %vm2676_vm1, %v2675_v15  ;;  %2373 = vmatpush3.bf16.msra.mxu1 %v2444_v47 }
0x1576   :  { %2374 = vmatprep.subr.bf16.mxu1 %v2675_v15 }
0x1579   :  { %2375 = vmatpush3.bf16.msra.mxu1 %v2445_v49 }
0x157a   :  { %2380 = vmatprep.subr.bf16.mxu1 %v2675_v15 }
0x1634   :  { %v1693_v59 = vpop.f32.mrf.mxu1 }
0x1635   :  { %v1694_v62 = vadd.f32 %v1693_v59, %v1643_v40 }
0x1636   :  { %v2358_v0 = vpop.f32.mrf.mxu1 }
0x1637   :  { %v1700_v25 = vmul.f32 %v1694_v62, %v1694_v62  ;;  %v1837_v0 = vrot.slane %v2994_v56, %v998_v45  ;;  %v2447_v45 = vld [vmem:[%s3183_s9] sm:$0xff]   ;;  %s2682_s9 = smov [#allocation13]  }
0x1638   :  { %v1696_v3 = vpop.f32.mrf.mxu1  ;;  %v2514_v56 = vld [vmem:[#allocation7] sm:$0xff]  ;;  %s2050_s2 = sshll.u32 %s2682_s9, 4  ;;  %s2051_s2 = int_to_ptr.vmem [resolvable:$true] %s2050_s2 }
0x1639   :  { %v1702_v36 = vmul.f32 %v1700_v25, %v1694_v62  ;;  %v1697_v4 = vadd.f32 %v1696_v3, %v1643_v40  ;;  %s2635_s25 = scalar_lea.vmem %s2051_s2, 32  ;;  %p2640_p3 = scmp.lt.s32.totalorder %s2051_s2, %s2051_s2 }
0x163a   :  { %v2359_v5 = vpop.f32.mrf.mxu1  ;;  %p2636_p2 = scmp.ne.s32.totalorder %s2051_s2, %s2635_s25  ;;  %p2641_p4 = scmp.lt.s32.totalorder %s2635_s25, %s2635_s25 }
0x163b   :  { %v1704_v37 = vmul.f32 0.044715, %v1702_v36  ;;  %v1701_v6 = vmul.f32 %v1697_v4, %v1697_v4 }
0x163c   :  { %p2642_p5 = por %p2641_p4, %p2640_p3 }
0x163d   :  { %v1706_v7 = vadd.f32 %v1704_v37, %v1694_v62  ;;  %v1703_v8 = vmul.f32 %v1701_v6, %v1697_v4 }
0x163e   :  { %p2643_p6 = pnand %p2642_p5, %p2636_p2 }
0x163f   :  { %v1708_v9 = vmul.f32 0.7978846, %v1706_v7  ;;  %v1705_v10 = vmul.f32 0.044715, %v1703_v8 }
0x1641   :  { %2502 = vtanh.f32 %v1708_v9  ;;  %v1707_v11 = vadd.f32 %v1705_v10, %v1697_v4 }
0x1643   :  { %v1709_v12 = vmul.f32 0.7978846, %v1707_v11  ;;  %v1849_v11 = vrot.slane %v2514_v56, %v2925_v48 }
0x1645   :  { %2504 = vtanh.f32 %v1709_v12 }
0x164e   :  { %v2503_v13 = vpop.eup %2502 }
0x164f   :  { %v1712_v1 = vadd.f32 1.0, %v2503_v13 }
0x1651   :  { %v1714_v14 = vmul.f32 0.5, %v1712_v1 }
0x1652   :  { %v2505_v61 = vpop.eup %2504 }
0x1653   :  { %v1713_v16 = vadd.f32 1.0, %v2505_v61  ;;  %v1716_v19 = vmul.f32 %v1714_v14, %v1694_v62 }
0x1655   :  { %v1715_v18 = vmul.f32 0.5, %v1713_v16 }
0x1657   :  { %v1717_v20 = vmul.f32 %v1715_v18, %v1697_v4 }
0x1659   :  { %v1727_v30 = vpack.c.bf16 %v1717_v20, %v1716_v19  ;;  %v2448_v19 = vld [vmem:[#allocation11 + $0x8] sm:$0xff]   ;;  %v2449_v20 = vld [vmem:[#allocation11] sm:$0xff]  }
0x165b   :  { %2369 = vmatmul.mubr.msk.bf16.vlgmr.msra.gmra.mxu0 %vm917_vm5, %v1727_v30  ;;  %v1922_v30 = vrot.slane %v2514_v56, %v2930_v17 }
0x165c   :  { %2392 = vmatprep.mubr.msk.bf16.mxu0 %vm2676_vm1, %v2675_v15  ;;  %2389 = vmatpush3.bf16.msra.mxu0 %v2448_v19 }
0x165d   :  { %2390 = vmatprep.subr.bf16.mxu0 %v2675_v15 }
0x1660   :  { %2391 = vmatpush3.bf16.msra.mxu0 %v2449_v20 }
0x171b   :  { %v1793_v21 = vpop.f32.mrf.mxu0 }
0x171c   :  { %v1794_v22 = vadd.f32 %v1793_v21, %v1731_v54 }
0x171d   :  { %v2370_v52 = vpop.f32.mrf.mxu0 }
0x171e   :  { %v1800_v44 = vadd.f32 %v1794_v22, %v1632_v63 }
0x171f   :  { %v1796_v23 = vpop.f32.mrf.mxu0 }
0x1720   :  { %v1797_v53 = vadd.f32 %v1796_v23, %v1731_v54  ;;  %v1802_v26 = vsel %vm125_vm0, %v1800_v44, 0.0 }
0x1721   :  { %1803 = vadd.xlane.f32.xlu1 %v1802_v26  ;;  %v2371_v27 = vpop.f32.mrf.mxu0 }
0x1722   :  { %v1801_v60 = vadd.f32 %v1797_v53, %v1633_v50  ;;  %v1987_v53 = vrot.slane %v2514_v56, %v2954_v32 }
0x1724   :  { %v1805_v28 = vsel %vm125_vm0, %v1801_v60, 0.0 }
0x1725   :  { %1806 = vadd.xlane.f32.xlu0 %v1805_v28 }
0x17aa   :  { %v1804_v29 = vpop.xlane.xlu1 %1803 }
0x17ab   :  { %v1808_v58 = vmul.f32 0.03125, %v1804_v29 }
0x17ad   :  { %v1810_v31 = vsub.f32 %v1800_v44, %v1808_v58 }
0x17ae   :  { %v1807_v33 = vpop.xlane.xlu0 %1806 }
0x17af   :  { %v1809_v34 = vmul.f32 0.03125, %v1807_v33  ;;  %v1812_v2 = vmul.f32 %v1810_v31, %v1810_v31 }
0x17b1   :  { %v1811_v38 = vsub.f32 %v1801_v60, %v1809_v34  ;;  %v1814_v41 = vsel %vm125_vm0, %v1812_v2, 0.0 }
0x17b2   :  { %1815 = vadd.xlane.f32.xlu1 %v1814_v41 }
0x17b3   :  { %v1813_v42 = vmul.f32 %v1811_v38, %v1811_v38 }
0x17b5   :  { %v1817_v46 = vsel %vm125_vm0, %v1813_v42, 0.0 }
0x17b6   :  { %1818 = vadd.xlane.f32.xlu0 %v1817_v46 }
0x183b   :  { %v1816_v63 = vpop.xlane.xlu1 %1815 }
0x183c   :  { %v1820_v50 = vmul.f32 0.03125, %v1816_v63 }
0x183e   :  { %v1822_v51 = vadd.f32 1e-12, %v1820_v50 }
0x183f   :  { %v1819_v55 = vpop.xlane.xlu0 %1818 }
0x1840   :  { %2506 = vrsqrt.f32 %v1822_v51  ;;  %v1821_v57 = vmul.f32 0.03125, %v1819_v55 }
0x1842   :  { %v1823_v43 = vadd.f32 1e-12, %v1821_v57 }
0x1844   :  { %2508 = vrsqrt.f32 %v1823_v43 }
0x184d   :  { %v2507_v40 = vpop.eup %2506 }
0x184e   :  { %v1826_v59 = vmul.f32 %v2507_v40, %v1810_v31 }
0x1850   :  { %v1832_v62 = vmul.f32 %v1831_v39, %v1826_v59 }
0x1851   :  { %v2509_v25 = vpop.eup %2508 }
0x1852   :  { %v1827_v3 = vmul.f32 %v2509_v25, %v1811_v38  ;;  %v1838_v4 = vadd.f32 %v1837_v0, %v1832_v62 }
0x1854   :  { %v1833_v36 = vmul.f32 %v1831_v39, %v1827_v3  ;;  %v1844_v37 = vpack.c.bf16 %v1838_v4, %v1838_v4 }
0x1856   :  { %v1839_v5 = vadd.f32 %v1837_v0, %v1833_v36  ;;  %v1852_v8 = vunpack.c.l.b16 %v1844_v37 }
0x1858   :  { %v1845_v6 = vpack.c.bf16 %v1839_v5, %v1839_v5 }
0x185a   :  { %v1853_v7 = vunpack.c.l.b16 %v1845_v6 }
0x185c   :  { %v1854_v9 = vrot.slane %v1853_v7, 7 }
0x185e   :  { %v1856_v10 = vsel %vm1855_vm6, %v1854_v9, %v1852_v8 }
0x185f   :  { %v1857_v35 = vpack.c.b16 %v1856_v10, %v1856_v10 }
0x1861   :  { %2377 = vmatmul.mubr.msk.bf16.vlgmr.msra.gmra.mxu1 %vm125_vm0, %v1857_v35 }
0x1862   :  { %2384 = vmatprep.mubr.msk.bf16.mxu1 %vm2676_vm1, %v2675_v15  ;;  %2381 = vmatpush3.bf16.msra.mxu1 %v2446_v24 }
0x1863   :  { %2382 = vmatprep.subr.bf16.mxu1 %v2675_v15 }
0x1866   :  { %2383 = vmatpush3.bf16.msra.mxu1 %v2447_v45 }
0x1921   :  { %v1907_v12 = vpop.f32.mrf.mxu1 }
0x1922   :  { %v1908_v13 = vadd.f32 %v1907_v12, %v1849_v11 }
0x1923   :  { %v2378_v1 = vpop.f32.mrf.mxu1 }
0x1924   :  { %2510 = vtanh.f32 %v1908_v13 }
0x1925   :  { %v1910_v61 = vpop.f32.mrf.mxu1 }
0x1927   :  { %v2379_v14 = vpop.f32.mrf.mxu1 }
0x1931   :  { %v2511_v16 = vpop.eup %2510 }
0x1932   :  { %v1918_v18 = vpack.c.bf16 %v2511_v16, %v2511_v16 }
0x1934   :  { %2385 = vmatmul.mubr.msk.bf16.vlgmr.msra.gmra.mxu1 %vm125_vm0, %v1918_v18 }
0x19f4   :  { %v1972_v54 = vpop.f32.mrf.mxu1 }
0x19f5   :  { %v1973_v48 = vadd.f32 %v1972_v54, %v1922_v30 }
0x19f6   :  { %v2386_v21 = vpop.f32.mrf.mxu1 }
0x19f7   :  { %2512 = vtanh.f32 %v1973_v48 }
0x19f8   :  { %v1975_v22 = vpop.f32.mrf.mxu1 }
0x19fa   :  { %v2387_v52 = vpop.f32.mrf.mxu1 }
0x1a04   :  { %v2513_v44 = vpop.eup %2512 }
0x1a05   :  { %v1983_v23 = vpack.c.bf16 %v2513_v44, %v2513_v44 }
0x1a07   :  { %2393 = vmatmul.mubr.msk.bf16.vlgmr.msra.gmra.mxu0 %vm125_vm0, %v1983_v23 }
0x1ac7   :  { %v2037_v26 = vpop.f32.mrf.mxu0 }
0x1ac8   :  { %v2038_v15 = vadd.f32 %v2037_v26, %v1987_v53 }
0x1ac9   :  { %v2394_v27 = vpop.f32.mrf.mxu0 }
0x1aca   :  { %2043 = vst [vmem:[#allocation13] sm:$0x3] %v2038_v15 }
0x1acb   :  { %v2040_v17 = vpop.f32.mrf.mxu0 }
0x1acc   :  { %2646 = shalt.err (!%p2643_p6)
}
0x1acd   :  { %2053 = dma.vmem_to_hbm [thread:$0]  %s2051_s2, 32, %s3185_s11, [#allocation4]   ;;  %v2395_v32 = vpop.f32.mrf.mxu0 }
0x1ace   :  { %2663 = dma.done.wait [#allocation4], 32  }
0x1acf   :  { %2664 = vsyncadd [#allocation4], 4294967264 }
0x1ad0   :  { %2057 = vsyncpa [#allocation3], 1 }
0x1ad1   :  { %2058 = vsyncpa [#allocation6], 1 }
0x1ad2   :  { %2059 = vsyncpa [#allocation9], 1 }
0x1ad3   :  { %2060 = vsyncpa [#allocation12], 1 }
0x1ad4   :  { %2061 = vsyncpa [#allocation4], 1 }

</bundles_post_ra>
